<compile_context>
chip_gen: v7x
topology: tpu7x:2x2x1
jax: 0.10.0
libtpu: 0.0.40
codegen_flags: <defaults>
</compile_context>

<pallas_src>
import jax
import jax.numpy as jnp
from jax import lax
from jax.experimental import pallas as pl
from jax.experimental.pallas import tpu as pltpu


_LN_EPS = 1e-5                      # torch.nn.LayerNorm default
_GELU_C = 0.7978845608028654        # sqrt(2 / pi)


def _gelu(x):
    # TODO(synk): PyTorch nn.GELU() is the exact erf form; Mosaic has no
    # guaranteed erf lowering, so the tanh approximation is used here (and in
    # the reference), max abs deviation ~1e-3.
    return 0.5 * x * (1.0 + jnp.tanh(_GELU_C * (x + 0.044715 * x * x * x)))


def _layer_norm_cf(h, gamma, beta):
    """LayerNorm over the channel axis (axis 0) of a (C, T) channels-first tile."""
    mu = jnp.mean(h, axis=0, keepdims=True)
    d = h - mu
    var = jnp.mean(d * d, axis=0, keepdims=True)
    return d * lax.rsqrt(var + _LN_EPS) * gamma + beta


def _layer_norm_ref(h, gamma, beta):
    """Reference LayerNorm over the last axis (channels-last layout)."""
    mu = jnp.mean(h, axis=-1, keepdims=True)
    d = h - mu
    var = jnp.mean(d * d, axis=-1, keepdims=True)
    return d * lax.rsqrt(var + _LN_EPS) * gamma + beta


def _make_kernel(num_blocks: int, s: int, chunk: int, n_chunks: int):
    """num_blocks = 2 * layers (wmha + swmha per PointSwin attention layer)."""

    def kernel(x_ref, wup_ref, bup_ref,
               ag_ref, ab_ref, wa_ref, ba_ref,
               mg_ref, mb_ref, w1_ref, b1_ref, w2_ref, b2_ref,
               o_ref):
        # x_ref : (C_in, TLIN)       NCL tile of one batch element (channels-first)
        # o_ref : (C_out, TLIN * s)  NCL output tile
        # 1x1 conv of the upsample stage.  The nearest upsample commutes with
        # every following per-position op, so it is deferred to the store.
        h = jnp.dot(wup_ref[...], x_ref[...],
                    preferred_element_type=jnp.float32) + bup_ref[...]

        # Unrolled on purpose (num_blocks is small); for very deep decoders
        # switch to lax.fori_loop with dynamic ref[blk] indexing instead.
        for blk in range(num_blocks):
            # Residual(PreNorm(LN, emptyWSA)) == per-point dim->dim linear
            hn = _layer_norm_cf(h, ag_ref[blk], ab_ref[blk])
            h = h + jnp.dot(wa_ref[blk], hn,
                            preferred_element_type=jnp.float32) + ba_ref[blk]
            # Residual(PreNorm(LN, FeedForward)): dim -> mlp_dim -> GELU -> dim
            hn = _layer_norm_cf(h, mg_ref[blk], mb_ref[blk])
            u = _gelu(jnp.dot(w1_ref[blk], hn,
                              preferred_element_type=jnp.float32) + b1_ref[blk])
            h = h + jnp.dot(w2_ref[blk], u,
                            preferred_element_type=jnp.float32) + b2_ref[blk]

        # Nearest-neighbour upsample along length: out[:, l*s + r] = h[:, l].
        # Lane-chunked matmuls against a tiny one-hot expansion matrix that is
        # generated in-kernel, so its footprint/cost is constant in TLIN.
        p = lax.broadcasted_iota(jnp.int32, (chunk, chunk * s), 1)
        l = lax.broadcasted_iota(jnp.int32, (chunk, chunk * s), 0)
        e = ((p >= l * s) & (p < (l + 1) * s)).astype(jnp.float32)
        for j in range(n_chunks):
            hj = h[:, j * chunk:(j + 1) * chunk]
            o_ref[:, j * chunk * s:(j + 1) * chunk * s] = jnp.dot(
                hj, e, preferred_element_type=jnp.float32).astype(o_ref.dtype)

    return kernel


def _pick_length_tile(L: int, batch: int) -> int:
    """Largest lane-aligned tile dividing L (full extent for tiny/ragged L)."""
    cands = [t for t in (2048, 1024, 512, 256, 128) if L % t == 0]
    if not cands:
        return L                                   # single full-extent tile
    t = cands[0]
    # v7x shards "parallel" grid axes across 2 TensorCores: make sure there
    # are at least 2 grid steps when the length allows it.
    if batch * (L // t) < 2:
        for smaller in cands:
            if batch * (L // smaller) >= 2:
                t = smaller
                break
    return t


def empty_point_swin_decoder_layer(x, params, up_scale_factor: int,
                                   io_dtype=None):
    """x: (B, C_in, L) float32 (NCL). Returns (B, C_out, L * up_scale_factor).

    io_dtype: set to jnp.bfloat16 to halve HBM traffic for x / output
    (accumulation stays f32); default keeps exact f32 I/O.
    """
    B, C_in, L = x.shape
    s = int(up_scale_factor)
    assert L >= 1 and s >= 1, "need a non-empty sequence and positive scale"

    C_out = params["w_up"].shape[0]
    NB = params["w1"].shape[0]          # 2 * layers swin blocks
    mlp_dim = params["w1"].shape[1]
    N = L * s

    # Pad ragged-but-large L up to a lane multiple so we never build a huge
    # unaligned tile; every op is per-position, so the extra columns are junk
    # that gets sliced off at the end.
    L_pad = L
    if L % 128 != 0 and L > 256:
        L_pad = ((L + 127) // 128) * 128
        x = jnp.pad(x, ((0, 0), (0, 0), (0, L_pad - L)))

    TLIN = _pick_length_tile(L_pad, B)
    TOUT = TLIN * s
    n_tiles = L_pad // TLIN
    CHUNK = 128 if TLIN % 128 == 0 else TLIN
    n_chunks = TLIN // CHUNK

    out_dtype = jnp.dtype(io_dtype) if io_dtype is not None else jnp.float32
    if io_dtype is not None:
        x = x.astype(out_dtype)

    # Weights stay in their native (out_features, in_features) orientation;
    # biases / LN params become (C, 1) columns (broadcast over lanes / length).
    wup = params["w_up"]                                        # (C_out, C_in)
    bup = params["b_up"].reshape(C_out, 1)
    ag = params["attn_ln_g"].reshape(NB, C_out, 1)
    ab = params["attn_ln_b"].reshape(NB, C_out, 1)
    wa = params["w_attn"]                                       # (NB, C_out, C_out)
    ba = params["b_attn"].reshape(NB, C_out, 1)
    mg = params["mlp_ln_g"].reshape(NB, C_out, 1)
    mb = params["mlp_ln_b"].reshape(NB, C_out, 1)
    w1 = params["w1"]                                           # (NB, mlp_dim, C_out)
    b1 = params["b1"].reshape(NB, mlp_dim, 1)
    w2 = params["w2"]                                           # (NB, C_out, mlp_dim)
    b2 = params["b2"].reshape(NB, C_out, 1)
    weights = (wup, bup, ag, ab, wa, ba, mg, mb, w1, b1, w2, b2)

    def full(a):
        shape = a.shape
        return pl.BlockSpec(shape, lambda b, j: (0,) * len(shape))

    # VMEM budget: double-buffered I/O tiles + resident stacked weights + live
    # activations + the tiny expansion matrix, with 2x headroom, clamped well
    # below v7x's 64 MiB physical VMEM.
    itemsize = 4
    footprint = (2 * (C_in * TLIN + C_out * TOUT) * itemsize
                 + 2 * sum(int(w.size) for w in weights) * itemsize
                 + 2 * (2 * C_out + C_in + mlp_dim) * TLIN * itemsize
                 + CHUNK * CHUNK * s * itemsize)
    vmem_limit = int(min(48 * 1024 * 1024, max(16 * 1024 * 1024, 2 * footprint)))

    out = pl.pallas_call(
        _make_kernel(NB, s, CHUNK, n_chunks),
        out_shape=jax.ShapeDtypeStruct((B, C_out, L_pad * s), out_dtype),
        grid=(B, n_tiles),
        in_specs=[pl.BlockSpec((None, C_in, TLIN), lambda b, j: (b, 0, j))]
                 + [full(w) for w in weights],
        out_specs=pl.BlockSpec((None, C_out, TOUT), lambda b, j: (b, 0, j)),
        compiler_params=pltpu.CompilerParams(
            dimension_semantics=("parallel", "parallel"),
            vmem_limit_bytes=vmem_limit,
        ),
    )(x, *weights)

    if L_pad != L:
        out = out[:, :, :N]
    return out


def reference(x, params, s):
    """Pure-JAX mirror of the PyTorch forward (upsample FIRST, like nn.Upsample)."""
    hp = lax.Precision.HIGHEST
    xu = jnp.repeat(x, s, axis=2)                               # nearest upsample (NCL)
    h = jnp.einsum("oc,bcn->bno", params["w_up"], xu, precision=hp) + params["b_up"]
    NB = params["w_attn"].shape[0]
    for i in range(NB):
        hn = _layer_norm_ref(h, params["attn_ln_g"][i], params["attn_ln_b"][i])
        h = h + jnp.einsum("bnc,oc->bno", hn, params["w_attn"][i],
                           precision=hp) + params["b_attn"][i]
        hn = _layer_norm_ref(h, params["mlp_ln_g"][i], params["mlp_ln_b"][i])
        u = _gelu(jnp.einsum("bnc,hc->bnh", hn, params["w1"][i],
                             precision=hp) + params["b1"][i])
        h = h + jnp.einsum("bnh,oh->bno", u, params["w2"][i],
                           precision=hp) + params["b2"][i]
    return jnp.transpose(h, (0, 2, 1))


if __name__ == "__main__":
    # Small deterministic shapes consistent with the module:
    # decoder layer with in_channels=16 -> out_channels=8, upscale x2, 2 layers.
    B, C_in, C_out, L = 2, 16, 8, 16
    up_scale_factor, layers = 2, 2
    mlp_dim = 4 * C_out                 # PointSwin default: mlp_dim = dim * 4
    NB = 2 * layers                     # each layer = wmha block + swmha block

    key = jax.random.PRNGKey(0)
    ks = list(jax.random.split(key, 16))

    def uni(k, shape, fan_in):
        bound = 1.0 / (fan_in ** 0.5)
        return jax.random.uniform(k, shape, jnp.float32, -bound, bound)

    x = jax.random.normal(ks[0], (B, C_in, L), dtype=jnp.float32)
    params = {
        "w_up": uni(ks[1], (C_out, C_in), C_in),
        "b_up": uni(ks[2], (C_out,), C_in),
        "attn_ln_g": 1.0 + 0.1 * jax.random.normal(ks[3], (NB, C_out), jnp.float32),
        "attn_ln_b": 0.1 * jax.random.normal(ks[4], (NB, C_out), jnp.float32),
        "w_attn": uni(ks[5], (NB, C_out, C_out), C_out),
        "b_attn": uni(ks[6], (NB, C_out), C_out),
        "mlp_ln_g": 1.0 + 0.1 * jax.random.normal(ks[7], (NB, C_out), jnp.float32),
        "mlp_ln_b": 0.1 * jax.random.normal(ks[8], (NB, C_out), jnp.float32),
        "w1": uni(ks[9], (NB, mlp_dim, C_out), C_out),
        "b1": uni(ks[10], (NB, mlp_dim), C_out),
        "w2": uni(ks[11], (NB, C_out, mlp_dim), mlp_dim),
        "b2": uni(ks[12], (NB, C_out), mlp_dim),
    }

    out = empty_point_swin_decoder_layer(x, params, up_scale_factor)
    out = jax.block_until_ready(out)

    ref = reference(x, params, up_scale_factor)
    assert out.shape == (B, C_out, L * up_scale_factor), out.shape
    err = float(jnp.max(jnp.abs(out - ref)))
    assert err < 1e-3, f"mismatch vs reference, max abs err = {err}"

    print("KERNEL_OK")
</pallas_src>

<mosaic_0001>
module attributes {stable_mosaic.version = 11 : i64} {
  func.func @kernel(%arg0: i32, %arg1: i32, %arg2: memref<1x16x16xf32, #tpu.memory_space<vmem>>, %arg3: memref<8x16xf32, #tpu.memory_space<vmem>>, %arg4: memref<8x1xf32, #tpu.memory_space<vmem>>, %arg5: memref<4x8x1xf32, #tpu.memory_space<vmem>>, %arg6: memref<4x8x1xf32, #tpu.memory_space<vmem>>, %arg7: memref<4x8x8xf32, #tpu.memory_space<vmem>>, %arg8: memref<4x8x1xf32, #tpu.memory_space<vmem>>, %arg9: memref<4x8x1xf32, #tpu.memory_space<vmem>>, %arg10: memref<4x8x1xf32, #tpu.memory_space<vmem>>, %arg11: memref<4x32x8xf32, #tpu.memory_space<vmem>>, %arg12: memref<4x32x1xf32, #tpu.memory_space<vmem>>, %arg13: memref<4x8x32xf32, #tpu.memory_space<vmem>>, %arg14: memref<4x8x1xf32, #tpu.memory_space<vmem>>, %arg15: memref<1x8x32xf32, #tpu.memory_space<vmem>>) attributes {dimension_semantics = [#tpu.dimension_semantics<parallel>, #tpu.dimension_semantics<parallel>], iteration_bounds = array<i64: 2, 1>, scalar_prefetch = 0 : i64, scratch_operands = 0 : i64, tpu.core_type = #tpu.core_type<tc>, window_params = [{transform_indices = @transform_0, window_bounds = array<i64: 1, 16, 16>}, {pipeline_mode = #tpu.pipeline_mode<synchronous>, transform_indices = @transform_1, window_bounds = array<i64: 8, 16>}, {pipeline_mode = #tpu.pipeline_mode<synchronous>, transform_indices = @transform_2, window_bounds = array<i64: 8, 1>}, {pipeline_mode = #tpu.pipeline_mode<synchronous>, transform_indices = @transform_3, window_bounds = array<i64: 4, 8, 1>}, {pipeline_mode = #tpu.pipeline_mode<synchronous>, transform_indices = @transform_4, window_bounds = array<i64: 4, 8, 1>}, {pipeline_mode = #tpu.pipeline_mode<synchronous>, transform_indices = @transform_5, window_bounds = array<i64: 4, 8, 8>}, {pipeline_mode = #tpu.pipeline_mode<synchronous>, transform_indices = @transform_6, window_bounds = array<i64: 4, 8, 1>}, {pipeline_mode = #tpu.pipeline_mode<synchronous>, transform_indices = @transform_7, window_bounds = array<i64: 4, 8, 1>}, {pipeline_mode = #tpu.pipeline_mode<synchronous>, transform_indices = @transform_8, window_bounds = array<i64: 4, 8, 1>}, {pipeline_mode = #tpu.pipeline_mode<synchronous>, transform_indices = @transform_9, window_bounds = array<i64: 4, 32, 8>}, {pipeline_mode = #tpu.pipeline_mode<synchronous>, transform_indices = @transform_10, window_bounds = array<i64: 4, 32, 1>}, {pipeline_mode = #tpu.pipeline_mode<synchronous>, transform_indices = @transform_11, window_bounds = array<i64: 4, 8, 32>}, {pipeline_mode = #tpu.pipeline_mode<synchronous>, transform_indices = @transform_12, window_bounds = array<i64: 4, 8, 1>}, {transform_indices = @transform_13, window_bounds = array<i64: 1, 8, 32>}]} {
    %c0 = arith.constant 0 : index
    %c0_0 = arith.constant 0 : index
    %0 = vector.load %arg3[%c0, %c0_0] : memref<8x16xf32, #tpu.memory_space<vmem>>, vector<8x16xf32>
    %c0_1 = arith.constant 0 : index
    %c0_2 = arith.constant 0 : index
    %c0_3 = arith.constant 0 : index
    %1 = vector.load %arg2[%c0_1, %c0_2, %c0_3] : memref<1x16x16xf32, #tpu.memory_space<vmem>>, vector<1x16x16xf32>
    %2 = vector.shape_cast %1 : vector<1x16x16xf32> to vector<16x16xf32>
    %cst = arith.constant dense<0.000000e+00> : vector<8x16xf32>
    %3 = tpu.matmul %0, %2, %cst {dimension_numbers = #tpu.dot_dimension_numbers<[1], [0], [0], [1], [0, 0, 1, 1], [], []>} : vector<8x16xf32>, vector<16x16xf32>, vector<8x16xf32> -> vector<8x16xf32>
    %c0_4 = arith.constant 0 : index
    %c0_5 = arith.constant 0 : index
    %4 = vector.load %arg4[%c0_4, %c0_5] : memref<8x1xf32, #tpu.memory_space<vmem>>, vector<8x1xf32>
    %5 = vector.broadcast %4 : vector<8x1xf32> to vector<8x16xf32>
    %6 = arith.addf %3, %5 : vector<8x16xf32>
    %c0_6 = arith.constant 0 : index
    %c0_7 = arith.constant 0 : index
    %c0_8 = arith.constant 0 : index
    %7 = vector.load %arg5[%c0_6, %c0_7, %c0_8] : memref<4x8x1xf32, #tpu.memory_space<vmem>>, vector<1x8x1xf32>
    %8 = vector.shape_cast %7 : vector<1x8x1xf32> to vector<8x1xf32>
    %c0_9 = arith.constant 0 : index
    %c0_10 = arith.constant 0 : index
    %c0_11 = arith.constant 0 : index
    %9 = vector.load %arg6[%c0_9, %c0_10, %c0_11] : memref<4x8x1xf32, #tpu.memory_space<vmem>>, vector<1x8x1xf32>
    %10 = vector.shape_cast %9 : vector<1x8x1xf32> to vector<8x1xf32>
    %cst_12 = arith.constant dense<0.000000e+00> : vector<16xf32>
    %11 = vector.multi_reduction <add>, %6, %cst_12 [0] : vector<8x16xf32> to vector<16xf32>
    %12 = vector.shape_cast %11 : vector<16xf32> to vector<1x16xf32>
    %cst_13 = arith.constant 8.000000e+00 : f32
    %13 = vector.broadcast %cst_13 : f32 to vector<1x16xf32>
    %14 = arith.divf %12, %13 : vector<1x16xf32>
    %15 = vector.broadcast %14 : vector<1x16xf32> to vector<8x16xf32>
    %16 = arith.subf %6, %15 : vector<8x16xf32>
    %17 = arith.mulf %16, %16 : vector<8x16xf32>
    %cst_14 = arith.constant dense<0.000000e+00> : vector<16xf32>
    %18 = vector.multi_reduction <add>, %17, %cst_14 [0] : vector<8x16xf32> to vector<16xf32>
    %19 = vector.shape_cast %18 : vector<16xf32> to vector<1x16xf32>
    %cst_15 = arith.constant 8.000000e+00 : f32
    %20 = vector.broadcast %cst_15 : f32 to vector<1x16xf32>
    %21 = arith.divf %19, %20 : vector<1x16xf32>
    %cst_16 = arith.constant 9.99999974E-6 : f32
    %22 = vector.broadcast %cst_16 : f32 to vector<1x16xf32>
    %23 = arith.addf %21, %22 : vector<1x16xf32>
    %24 = math.rsqrt %23 : vector<1x16xf32>
    %25 = vector.broadcast %24 : vector<1x16xf32> to vector<8x16xf32>
    %26 = arith.mulf %16, %25 : vector<8x16xf32>
    %27 = vector.broadcast %8 : vector<8x1xf32> to vector<8x16xf32>
    %28 = arith.mulf %26, %27 : vector<8x16xf32>
    %29 = vector.broadcast %10 : vector<8x1xf32> to vector<8x16xf32>
    %30 = arith.addf %28, %29 : vector<8x16xf32>
    %c0_17 = arith.constant 0 : index
    %c0_18 = arith.constant 0 : index
    %c0_19 = arith.constant 0 : index
    %31 = vector.load %arg7[%c0_17, %c0_18, %c0_19] : memref<4x8x8xf32, #tpu.memory_space<vmem>>, vector<1x8x8xf32>
    %32 = vector.shape_cast %31 : vector<1x8x8xf32> to vector<8x8xf32>
    %cst_20 = arith.constant dense<0.000000e+00> : vector<8x16xf32>
    %33 = tpu.matmul %32, %30, %cst_20 {dimension_numbers = #tpu.dot_dimension_numbers<[1], [0], [0], [1], [0, 0, 1, 1], [], []>} : vector<8x8xf32>, vector<8x16xf32>, vector<8x16xf32> -> vector<8x16xf32>
    %34 = arith.addf %6, %33 : vector<8x16xf32>
    %c0_21 = arith.constant 0 : index
    %c0_22 = arith.constant 0 : index
    %c0_23 = arith.constant 0 : index
    %35 = vector.load %arg8[%c0_21, %c0_22, %c0_23] : memref<4x8x1xf32, #tpu.memory_space<vmem>>, vector<1x8x1xf32>
    %36 = vector.shape_cast %35 : vector<1x8x1xf32> to vector<8x1xf32>
    %37 = vector.broadcast %36 : vector<8x1xf32> to vector<8x16xf32>
    %38 = arith.addf %34, %37 : vector<8x16xf32>
    %c0_24 = arith.constant 0 : index
    %c0_25 = arith.constant 0 : index
    %c0_26 = arith.constant 0 : index
    %39 = vector.load %arg9[%c0_24, %c0_25, %c0_26] : memref<4x8x1xf32, #tpu.memory_space<vmem>>, vector<1x8x1xf32>
    %40 = vector.shape_cast %39 : vector<1x8x1xf32> to vector<8x1xf32>
    %c0_27 = arith.constant 0 : index
    %c0_28 = arith.constant 0 : index
    %c0_29 = arith.constant 0 : index
    %41 = vector.load %arg10[%c0_27, %c0_28, %c0_29] : memref<4x8x1xf32, #tpu.memory_space<vmem>>, vector<1x8x1xf32>
    %42 = vector.shape_cast %41 : vector<1x8x1xf32> to vector<8x1xf32>
    %cst_30 = arith.constant dense<0.000000e+00> : vector<16xf32>
    %43 = vector.multi_reduction <add>, %38, %cst_30 [0] : vector<8x16xf32> to vector<16xf32>
    %44 = vector.shape_cast %43 : vector<16xf32> to vector<1x16xf32>
    %cst_31 = arith.constant 8.000000e+00 : f32
    %45 = vector.broadcast %cst_31 : f32 to vector<1x16xf32>
    %46 = arith.divf %44, %45 : vector<1x16xf32>
    %47 = vector.broadcast %46 : vector<1x16xf32> to vector<8x16xf32>
    %48 = arith.subf %38, %47 : vector<8x16xf32>
    %49 = arith.mulf %48, %48 : vector<8x16xf32>
    %cst_32 = arith.constant dense<0.000000e+00> : vector<16xf32>
    %50 = vector.multi_reduction <add>, %49, %cst_32 [0] : vector<8x16xf32> to vector<16xf32>
    %51 = vector.shape_cast %50 : vector<16xf32> to vector<1x16xf32>
    %cst_33 = arith.constant 8.000000e+00 : f32
    %52 = vector.broadcast %cst_33 : f32 to vector<1x16xf32>
    %53 = arith.divf %51, %52 : vector<1x16xf32>
    %cst_34 = arith.constant 9.99999974E-6 : f32
    %54 = vector.broadcast %cst_34 : f32 to vector<1x16xf32>
    %55 = arith.addf %53, %54 : vector<1x16xf32>
    %56 = math.rsqrt %55 : vector<1x16xf32>
    %57 = vector.broadcast %56 : vector<1x16xf32> to vector<8x16xf32>
    %58 = arith.mulf %48, %57 : vector<8x16xf32>
    %59 = vector.broadcast %40 : vector<8x1xf32> to vector<8x16xf32>
    %60 = arith.mulf %58, %59 : vector<8x16xf32>
    %61 = vector.broadcast %42 : vector<8x1xf32> to vector<8x16xf32>
    %62 = arith.addf %60, %61 : vector<8x16xf32>
    %c0_35 = arith.constant 0 : index
    %c0_36 = arith.constant 0 : index
    %c0_37 = arith.constant 0 : index
    %63 = vector.load %arg11[%c0_35, %c0_36, %c0_37] : memref<4x32x8xf32, #tpu.memory_space<vmem>>, vector<1x32x8xf32>
    %64 = vector.shape_cast %63 : vector<1x32x8xf32> to vector<32x8xf32>
    %cst_38 = arith.constant dense<0.000000e+00> : vector<32x16xf32>
    %65 = tpu.matmul %64, %62, %cst_38 {dimension_numbers = #tpu.dot_dimension_numbers<[1], [0], [0], [1], [0, 0, 1, 1], [], []>} : vector<32x8xf32>, vector<8x16xf32>, vector<32x16xf32> -> vector<32x16xf32>
    %c0_39 = arith.constant 0 : index
    %c0_40 = arith.constant 0 : index
    %c0_41 = arith.constant 0 : index
    %66 = vector.load %arg12[%c0_39, %c0_40, %c0_41] : memref<4x32x1xf32, #tpu.memory_space<vmem>>, vector<1x32x1xf32>
    %67 = vector.shape_cast %66 : vector<1x32x1xf32> to vector<32x1xf32>
    %68 = vector.broadcast %67 : vector<32x1xf32> to vector<32x16xf32>
    %69 = arith.addf %65, %68 : vector<32x16xf32>
    %cst_42 = arith.constant 5.000000e-01 : f32
    %70 = vector.broadcast %cst_42 : f32 to vector<32x16xf32>
    %71 = arith.mulf %70, %69 : vector<32x16xf32>
    %cst_43 = arith.constant 4.471500e-02 : f32
    %72 = vector.broadcast %cst_43 : f32 to vector<32x16xf32>
    %73 = arith.mulf %72, %69 : vector<32x16xf32>
    %74 = arith.mulf %73, %69 : vector<32x16xf32>
    %75 = arith.mulf %74, %69 : vector<32x16xf32>
    %76 = arith.addf %69, %75 : vector<32x16xf32>
    %cst_44 = arith.constant 0.797884583 : f32
    %77 = vector.broadcast %cst_44 : f32 to vector<32x16xf32>
    %78 = arith.mulf %77, %76 : vector<32x16xf32>
    %79 = math.tanh %78 : vector<32x16xf32>
    %cst_45 = arith.constant 1.000000e+00 : f32
    %80 = vector.broadcast %cst_45 : f32 to vector<32x16xf32>
    %81 = arith.addf %80, %79 : vector<32x16xf32>
    %82 = arith.mulf %71, %81 : vector<32x16xf32>
    %c0_46 = arith.constant 0 : index
    %c0_47 = arith.constant 0 : index
    %c0_48 = arith.constant 0 : index
    %83 = vector.load %arg13[%c0_46, %c0_47, %c0_48] : memref<4x8x32xf32, #tpu.memory_space<vmem>>, vector<1x8x32xf32>
    %84 = vector.shape_cast %83 : vector<1x8x32xf32> to vector<8x32xf32>
    %cst_49 = arith.constant dense<0.000000e+00> : vector<8x16xf32>
    %85 = tpu.matmul %84, %82, %cst_49 {dimension_numbers = #tpu.dot_dimension_numbers<[1], [0], [0], [1], [0, 0, 1, 1], [], []>} : vector<8x32xf32>, vector<32x16xf32>, vector<8x16xf32> -> vector<8x16xf32>
    %86 = arith.addf %38, %85 : vector<8x16xf32>
    %c0_50 = arith.constant 0 : index
    %c0_51 = arith.constant 0 : index
    %c0_52 = arith.constant 0 : index
    %87 = vector.load %arg14[%c0_50, %c0_51, %c0_52] : memref<4x8x1xf32, #tpu.memory_space<vmem>>, vector<1x8x1xf32>
    %88 = vector.shape_cast %87 : vector<1x8x1xf32> to vector<8x1xf32>
    %89 = vector.broadcast %88 : vector<8x1xf32> to vector<8x16xf32>
    %90 = arith.addf %86, %89 : vector<8x16xf32>
    %c1 = arith.constant 1 : index
    %c0_53 = arith.constant 0 : index
    %c0_54 = arith.constant 0 : index
    %91 = vector.load %arg5[%c1, %c0_53, %c0_54] : memref<4x8x1xf32, #tpu.memory_space<vmem>>, vector<1x8x1xf32>
    %92 = vector.shape_cast %91 : vector<1x8x1xf32> to vector<8x1xf32>
    %c1_55 = arith.constant 1 : index
    %c0_56 = arith.constant 0 : index
    %c0_57 = arith.constant 0 : index
    %93 = vector.load %arg6[%c1_55, %c0_56, %c0_57] : memref<4x8x1xf32, #tpu.memory_space<vmem>>, vector<1x8x1xf32>
    %94 = vector.shape_cast %93 : vector<1x8x1xf32> to vector<8x1xf32>
    %cst_58 = arith.constant dense<0.000000e+00> : vector<16xf32>
    %95 = vector.multi_reduction <add>, %90, %cst_58 [0] : vector<8x16xf32> to vector<16xf32>
    %96 = vector.shape_cast %95 : vector<16xf32> to vector<1x16xf32>
    %cst_59 = arith.constant 8.000000e+00 : f32
    %97 = vector.broadcast %cst_59 : f32 to vector<1x16xf32>
    %98 = arith.divf %96, %97 : vector<1x16xf32>
    %99 = vector.broadcast %98 : vector<1x16xf32> to vector<8x16xf32>
    %100 = arith.subf %90, %99 : vector<8x16xf32>
    %101 = arith.mulf %100, %100 : vector<8x16xf32>
    %cst_60 = arith.constant dense<0.000000e+00> : vector<16xf32>
    %102 = vector.multi_reduction <add>, %101, %cst_60 [0] : vector<8x16xf32> to vector<16xf32>
    %103 = vector.shape_cast %102 : vector<16xf32> to vector<1x16xf32>
    %cst_61 = arith.constant 8.000000e+00 : f32
    %104 = vector.broadcast %cst_61 : f32 to vector<1x16xf32>
    %105 = arith.divf %103, %104 : vector<1x16xf32>
    %cst_62 = arith.constant 9.99999974E-6 : f32
    %106 = vector.broadcast %cst_62 : f32 to vector<1x16xf32>
    %107 = arith.addf %105, %106 : vector<1x16xf32>
    %108 = math.rsqrt %107 : vector<1x16xf32>
    %109 = vector.broadcast %108 : vector<1x16xf32> to vector<8x16xf32>
    %110 = arith.mulf %100, %109 : vector<8x16xf32>
    %111 = vector.broadcast %92 : vector<8x1xf32> to vector<8x16xf32>
    %112 = arith.mulf %110, %111 : vector<8x16xf32>
    %113 = vector.broadcast %94 : vector<8x1xf32> to vector<8x16xf32>
    %114 = arith.addf %112, %113 : vector<8x16xf32>
    %c1_63 = arith.constant 1 : index
    %c0_64 = arith.constant 0 : index
    %c0_65 = arith.constant 0 : index
    %115 = vector.load %arg7[%c1_63, %c0_64, %c0_65] : memref<4x8x8xf32, #tpu.memory_space<vmem>>, vector<1x8x8xf32>
    %116 = vector.shape_cast %115 : vector<1x8x8xf32> to vector<8x8xf32>
    %cst_66 = arith.constant dense<0.000000e+00> : vector<8x16xf32>
    %117 = tpu.matmul %116, %114, %cst_66 {dimension_numbers = #tpu.dot_dimension_numbers<[1], [0], [0], [1], [0, 0, 1, 1], [], []>} : vector<8x8xf32>, vector<8x16xf32>, vector<8x16xf32> -> vector<8x16xf32>
    %118 = arith.addf %90, %117 : vector<8x16xf32>
    %c1_67 = arith.constant 1 : index
    %c0_68 = arith.constant 0 : index
    %c0_69 = arith.constant 0 : index
    %119 = vector.load %arg8[%c1_67, %c0_68, %c0_69] : memref<4x8x1xf32, #tpu.memory_space<vmem>>, vector<1x8x1xf32>
    %120 = vector.shape_cast %119 : vector<1x8x1xf32> to vector<8x1xf32>
    %121 = vector.broadcast %120 : vector<8x1xf32> to vector<8x16xf32>
    %122 = arith.addf %118, %121 : vector<8x16xf32>
    %c1_70 = arith.constant 1 : index
    %c0_71 = arith.constant 0 : index
    %c0_72 = arith.constant 0 : index
    %123 = vector.load %arg9[%c1_70, %c0_71, %c0_72] : memref<4x8x1xf32, #tpu.memory_space<vmem>>, vector<1x8x1xf32>
    %124 = vector.shape_cast %123 : vector<1x8x1xf32> to vector<8x1xf32>
    %c1_73 = arith.constant 1 : index
    %c0_74 = arith.constant 0 : index
    %c0_75 = arith.constant 0 : index
    %125 = vector.load %arg10[%c1_73, %c0_74, %c0_75] : memref<4x8x1xf32, #tpu.memory_space<vmem>>, vector<1x8x1xf32>
    %126 = vector.shape_cast %125 : vector<1x8x1xf32> to vector<8x1xf32>
    %cst_76 = arith.constant dense<0.000000e+00> : vector<16xf32>
    %127 = vector.multi_reduction <add>, %122, %cst_76 [0] : vector<8x16xf32> to vector<16xf32>
    %128 = vector.shape_cast %127 : vector<16xf32> to vector<1x16xf32>
    %cst_77 = arith.constant 8.000000e+00 : f32
    %129 = vector.broadcast %cst_77 : f32 to vector<1x16xf32>
    %130 = arith.divf %128, %129 : vector<1x16xf32>
    %131 = vector.broadcast %130 : vector<1x16xf32> to vector<8x16xf32>
    %132 = arith.subf %122, %131 : vector<8x16xf32>
    %133 = arith.mulf %132, %132 : vector<8x16xf32>
    %cst_78 = arith.constant dense<0.000000e+00> : vector<16xf32>
    %134 = vector.multi_reduction <add>, %133, %cst_78 [0] : vector<8x16xf32> to vector<16xf32>
    %135 = vector.shape_cast %134 : vector<16xf32> to vector<1x16xf32>
    %cst_79 = arith.constant 8.000000e+00 : f32
    %136 = vector.broadcast %cst_79 : f32 to vector<1x16xf32>
    %137 = arith.divf %135, %136 : vector<1x16xf32>
    %cst_80 = arith.constant 9.99999974E-6 : f32
    %138 = vector.broadcast %cst_80 : f32 to vector<1x16xf32>
    %139 = arith.addf %137, %138 : vector<1x16xf32>
    %140 = math.rsqrt %139 : vector<1x16xf32>
    %141 = vector.broadcast %140 : vector<1x16xf32> to vector<8x16xf32>
    %142 = arith.mulf %132, %141 : vector<8x16xf32>
    %143 = vector.broadcast %124 : vector<8x1xf32> to vector<8x16xf32>
    %144 = arith.mulf %142, %143 : vector<8x16xf32>
    %145 = vector.broadcast %126 : vector<8x1xf32> to vector<8x16xf32>
    %146 = arith.addf %144, %145 : vector<8x16xf32>
    %c1_81 = arith.constant 1 : index
    %c0_82 = arith.constant 0 : index
    %c0_83 = arith.constant 0 : index
    %147 = vector.load %arg11[%c1_81, %c0_82, %c0_83] : memref<4x32x8xf32, #tpu.memory_space<vmem>>, vector<1x32x8xf32>
    %148 = vector.shape_cast %147 : vector<1x32x8xf32> to vector<32x8xf32>
    %cst_84 = arith.constant dense<0.000000e+00> : vector<32x16xf32>
    %149 = tpu.matmul %148, %146, %cst_84 {dimension_numbers = #tpu.dot_dimension_numbers<[1], [0], [0], [1], [0, 0, 1, 1], [], []>} : vector<32x8xf32>, vector<8x16xf32>, vector<32x16xf32> -> vector<32x16xf32>
    %c1_85 = arith.constant 1 : index
    %c0_86 = arith.constant 0 : index
    %c0_87 = arith.constant 0 : index
    %150 = vector.load %arg12[%c1_85, %c0_86, %c0_87] : memref<4x32x1xf32, #tpu.memory_space<vmem>>, vector<1x32x1xf32>
    %151 = vector.shape_cast %150 : vector<1x32x1xf32> to vector<32x1xf32>
    %152 = vector.broadcast %151 : vector<32x1xf32> to vector<32x16xf32>
    %153 = arith.addf %149, %152 : vector<32x16xf32>
    %cst_88 = arith.constant 5.000000e-01 : f32
    %154 = vector.broadcast %cst_88 : f32 to vector<32x16xf32>
    %155 = arith.mulf %154, %153 : vector<32x16xf32>
    %cst_89 = arith.constant 4.471500e-02 : f32
    %156 = vector.broadcast %cst_89 : f32 to vector<32x16xf32>
    %157 = arith.mulf %156, %153 : vector<32x16xf32>
    %158 = arith.mulf %157, %153 : vector<32x16xf32>
    %159 = arith.mulf %158, %153 : vector<32x16xf32>
    %160 = arith.addf %153, %159 : vector<32x16xf32>
    %cst_90 = arith.constant 0.797884583 : f32
    %161 = vector.broadcast %cst_90 : f32 to vector<32x16xf32>
    %162 = arith.mulf %161, %160 : vector<32x16xf32>
    %163 = math.tanh %162 : vector<32x16xf32>
    %cst_91 = arith.constant 1.000000e+00 : f32
    %164 = vector.broadcast %cst_91 : f32 to vector<32x16xf32>
    %165 = arith.addf %164, %163 : vector<32x16xf32>
    %166 = arith.mulf %155, %165 : vector<32x16xf32>
    %c1_92 = arith.constant 1 : index
    %c0_93 = arith.constant 0 : index
    %c0_94 = arith.constant 0 : index
    %167 = vector.load %arg13[%c1_92, %c0_93, %c0_94] : memref<4x8x32xf32, #tpu.memory_space<vmem>>, vector<1x8x32xf32>
    %168 = vector.shape_cast %167 : vector<1x8x32xf32> to vector<8x32xf32>
    %cst_95 = arith.constant dense<0.000000e+00> : vector<8x16xf32>
    %169 = tpu.matmul %168, %166, %cst_95 {dimension_numbers = #tpu.dot_dimension_numbers<[1], [0], [0], [1], [0, 0, 1, 1], [], []>} : vector<8x32xf32>, vector<32x16xf32>, vector<8x16xf32> -> vector<8x16xf32>
    %170 = arith.addf %122, %169 : vector<8x16xf32>
    %c1_96 = arith.constant 1 : index
    %c0_97 = arith.constant 0 : index
    %c0_98 = arith.constant 0 : index
    %171 = vector.load %arg14[%c1_96, %c0_97, %c0_98] : memref<4x8x1xf32, #tpu.memory_space<vmem>>, vector<1x8x1xf32>
    %172 = vector.shape_cast %171 : vector<1x8x1xf32> to vector<8x1xf32>
    %173 = vector.broadcast %172 : vector<8x1xf32> to vector<8x16xf32>
    %174 = arith.addf %170, %173 : vector<8x16xf32>
    %c2 = arith.constant 2 : index
    %c0_99 = arith.constant 0 : index
    %c0_100 = arith.constant 0 : index
    %175 = vector.load %arg5[%c2, %c0_99, %c0_100] : memref<4x8x1xf32, #tpu.memory_space<vmem>>, vector<1x8x1xf32>
    %176 = vector.shape_cast %175 : vector<1x8x1xf32> to vector<8x1xf32>
    %c2_101 = arith.constant 2 : index
    %c0_102 = arith.constant 0 : index
    %c0_103 = arith.constant 0 : index
    %177 = vector.load %arg6[%c2_101, %c0_102, %c0_103] : memref<4x8x1xf32, #tpu.memory_space<vmem>>, vector<1x8x1xf32>
    %178 = vector.shape_cast %177 : vector<1x8x1xf32> to vector<8x1xf32>
    %cst_104 = arith.constant dense<0.000000e+00> : vector<16xf32>
    %179 = vector.multi_reduction <add>, %174, %cst_104 [0] : vector<8x16xf32> to vector<16xf32>
    %180 = vector.shape_cast %179 : vector<16xf32> to vector<1x16xf32>
    %cst_105 = arith.constant 8.000000e+00 : f32
    %181 = vector.broadcast %cst_105 : f32 to vector<1x16xf32>
    %182 = arith.divf %180, %181 : vector<1x16xf32>
    %183 = vector.broadcast %182 : vector<1x16xf32> to vector<8x16xf32>
    %184 = arith.subf %174, %183 : vector<8x16xf32>
    %185 = arith.mulf %184, %184 : vector<8x16xf32>
    %cst_106 = arith.constant dense<0.000000e+00> : vector<16xf32>
    %186 = vector.multi_reduction <add>, %185, %cst_106 [0] : vector<8x16xf32> to vector<16xf32>
    %187 = vector.shape_cast %186 : vector<16xf32> to vector<1x16xf32>
    %cst_107 = arith.constant 8.000000e+00 : f32
    %188 = vector.broadcast %cst_107 : f32 to vector<1x16xf32>
    %189 = arith.divf %187, %188 : vector<1x16xf32>
    %cst_108 = arith.constant 9.99999974E-6 : f32
    %190 = vector.broadcast %cst_108 : f32 to vector<1x16xf32>
    %191 = arith.addf %189, %190 : vector<1x16xf32>
    %192 = math.rsqrt %191 : vector<1x16xf32>
    %193 = vector.broadcast %192 : vector<1x16xf32> to vector<8x16xf32>
    %194 = arith.mulf %184, %193 : vector<8x16xf32>
    %195 = vector.broadcast %176 : vector<8x1xf32> to vector<8x16xf32>
    %196 = arith.mulf %194, %195 : vector<8x16xf32>
    %197 = vector.broadcast %178 : vector<8x1xf32> to vector<8x16xf32>
    %198 = arith.addf %196, %197 : vector<8x16xf32>
    %c2_109 = arith.constant 2 : index
    %c0_110 = arith.constant 0 : index
    %c0_111 = arith.constant 0 : index
    %199 = vector.load %arg7[%c2_109, %c0_110, %c0_111] : memref<4x8x8xf32, #tpu.memory_space<vmem>>, vector<1x8x8xf32>
    %200 = vector.shape_cast %199 : vector<1x8x8xf32> to vector<8x8xf32>
    %cst_112 = arith.constant dense<0.000000e+00> : vector<8x16xf32>
    %201 = tpu.matmul %200, %198, %cst_112 {dimension_numbers = #tpu.dot_dimension_numbers<[1], [0], [0], [1], [0, 0, 1, 1], [], []>} : vector<8x8xf32>, vector<8x16xf32>, vector<8x16xf32> -> vector<8x16xf32>
    %202 = arith.addf %174, %201 : vector<8x16xf32>
    %c2_113 = arith.constant 2 : index
    %c0_114 = arith.constant 0 : index
    %c0_115 = arith.constant 0 : index
    %203 = vector.load %arg8[%c2_113, %c0_114, %c0_115] : memref<4x8x1xf32, #tpu.memory_space<vmem>>, vector<1x8x1xf32>
    %204 = vector.shape_cast %203 : vector<1x8x1xf32> to vector<8x1xf32>
    %205 = vector.broadcast %204 : vector<8x1xf32> to vector<8x16xf32>
    %206 = arith.addf %202, %205 : vector<8x16xf32>
    %c2_116 = arith.constant 2 : index
    %c0_117 = arith.constant 0 : index
    %c0_118 = arith.constant 0 : index
    %207 = vector.load %arg9[%c2_116, %c0_117, %c0_118] : memref<4x8x1xf32, #tpu.memory_space<vmem>>, vector<1x8x1xf32>
    %208 = vector.shape_cast %207 : vector<1x8x1xf32> to vector<8x1xf32>
    %c2_119 = arith.constant 2 : index
    %c0_120 = arith.constant 0 : index
    %c0_121 = arith.constant 0 : index
    %209 = vector.load %arg10[%c2_119, %c0_120, %c0_121] : memref<4x8x1xf32, #tpu.memory_space<vmem>>, vector<1x8x1xf32>
    %210 = vector.shape_cast %209 : vector<1x8x1xf32> to vector<8x1xf32>
    %cst_122 = arith.constant dense<0.000000e+00> : vector<16xf32>
    %211 = vector.multi_reduction <add>, %206, %cst_122 [0] : vector<8x16xf32> to vector<16xf32>
    %212 = vector.shape_cast %211 : vector<16xf32> to vector<1x16xf32>
    %cst_123 = arith.constant 8.000000e+00 : f32
    %213 = vector.broadcast %cst_123 : f32 to vector<1x16xf32>
    %214 = arith.divf %212, %213 : vector<1x16xf32>
    %215 = vector.broadcast %214 : vector<1x16xf32> to vector<8x16xf32>
    %216 = arith.subf %206, %215 : vector<8x16xf32>
    %217 = arith.mulf %216, %216 : vector<8x16xf32>
    %cst_124 = arith.constant dense<0.000000e+00> : vector<16xf32>
    %218 = vector.multi_reduction <add>, %217, %cst_124 [0] : vector<8x16xf32> to vector<16xf32>
    %219 = vector.shape_cast %218 : vector<16xf32> to vector<1x16xf32>
    %cst_125 = arith.constant 8.000000e+00 : f32
    %220 = vector.broadcast %cst_125 : f32 to vector<1x16xf32>
    %221 = arith.divf %219, %220 : vector<1x16xf32>
    %cst_126 = arith.constant 9.99999974E-6 : f32
    %222 = vector.broadcast %cst_126 : f32 to vector<1x16xf32>
    %223 = arith.addf %221, %222 : vector<1x16xf32>
    %224 = math.rsqrt %223 : vector<1x16xf32>
    %225 = vector.broadcast %224 : vector<1x16xf32> to vector<8x16xf32>
    %226 = arith.mulf %216, %225 : vector<8x16xf32>
    %227 = vector.broadcast %208 : vector<8x1xf32> to vector<8x16xf32>
    %228 = arith.mulf %226, %227 : vector<8x16xf32>
    %229 = vector.broadcast %210 : vector<8x1xf32> to vector<8x16xf32>
    %230 = arith.addf %228, %229 : vector<8x16xf32>
    %c2_127 = arith.constant 2 : index
    %c0_128 = arith.constant 0 : index
    %c0_129 = arith.constant 0 : index
    %231 = vector.load %arg11[%c2_127, %c0_128, %c0_129] : memref<4x32x8xf32, #tpu.memory_space<vmem>>, vector<1x32x8xf32>
    %232 = vector.shape_cast %231 : vector<1x32x8xf32> to vector<32x8xf32>
    %cst_130 = arith.constant dense<0.000000e+00> : vector<32x16xf32>
    %233 = tpu.matmul %232, %230, %cst_130 {dimension_numbers = #tpu.dot_dimension_numbers<[1], [0], [0], [1], [0, 0, 1, 1], [], []>} : vector<32x8xf32>, vector<8x16xf32>, vector<32x16xf32> -> vector<32x16xf32>
    %c2_131 = arith.constant 2 : index
    %c0_132 = arith.constant 0 : index
    %c0_133 = arith.constant 0 : index
    %234 = vector.load %arg12[%c2_131, %c0_132, %c0_133] : memref<4x32x1xf32, #tpu.memory_space<vmem>>, vector<1x32x1xf32>
    %235 = vector.shape_cast %234 : vector<1x32x1xf32> to vector<32x1xf32>
    %236 = vector.broadcast %235 : vector<32x1xf32> to vector<32x16xf32>
    %237 = arith.addf %233, %236 : vector<32x16xf32>
    %cst_134 = arith.constant 5.000000e-01 : f32
    %238 = vector.broadcast %cst_134 : f32 to vector<32x16xf32>
    %239 = arith.mulf %238, %237 : vector<32x16xf32>
    %cst_135 = arith.constant 4.471500e-02 : f32
    %240 = vector.broadcast %cst_135 : f32 to vector<32x16xf32>
    %241 = arith.mulf %240, %237 : vector<32x16xf32>
    %242 = arith.mulf %241, %237 : vector<32x16xf32>
    %243 = arith.mulf %242, %237 : vector<32x16xf32>
    %244 = arith.addf %237, %243 : vector<32x16xf32>
    %cst_136 = arith.constant 0.797884583 : f32
    %245 = vector.broadcast %cst_136 : f32 to vector<32x16xf32>
    %246 = arith.mulf %245, %244 : vector<32x16xf32>
    %247 = math.tanh %246 : vector<32x16xf32>
    %cst_137 = arith.constant 1.000000e+00 : f32
    %248 = vector.broadcast %cst_137 : f32 to vector<32x16xf32>
    %249 = arith.addf %248, %247 : vector<32x16xf32>
    %250 = arith.mulf %239, %249 : vector<32x16xf32>
    %c2_138 = arith.constant 2 : index
    %c0_139 = arith.constant 0 : index
    %c0_140 = arith.constant 0 : index
    %251 = vector.load %arg13[%c2_138, %c0_139, %c0_140] : memref<4x8x32xf32, #tpu.memory_space<vmem>>, vector<1x8x32xf32>
    %252 = vector.shape_cast %251 : vector<1x8x32xf32> to vector<8x32xf32>
    %cst_141 = arith.constant dense<0.000000e+00> : vector<8x16xf32>
    %253 = tpu.matmul %252, %250, %cst_141 {dimension_numbers = #tpu.dot_dimension_numbers<[1], [0], [0], [1], [0, 0, 1, 1], [], []>} : vector<8x32xf32>, vector<32x16xf32>, vector<8x16xf32> -> vector<8x16xf32>
    %254 = arith.addf %206, %253 : vector<8x16xf32>
    %c2_142 = arith.constant 2 : index
    %c0_143 = arith.constant 0 : index
    %c0_144 = arith.constant 0 : index
    %255 = vector.load %arg14[%c2_142, %c0_143, %c0_144] : memref<4x8x1xf32, #tpu.memory_space<vmem>>, vector<1x8x1xf32>
    %256 = vector.shape_cast %255 : vector<1x8x1xf32> to vector<8x1xf32>
    %257 = vector.broadcast %256 : vector<8x1xf32> to vector<8x16xf32>
    %258 = arith.addf %254, %257 : vector<8x16xf32>
    %c3 = arith.constant 3 : index
    %c0_145 = arith.constant 0 : index
    %c0_146 = arith.constant 0 : index
    %259 = vector.load %arg5[%c3, %c0_145, %c0_146] : memref<4x8x1xf32, #tpu.memory_space<vmem>>, vector<1x8x1xf32>
    %260 = vector.shape_cast %259 : vector<1x8x1xf32> to vector<8x1xf32>
    %c3_147 = arith.constant 3 : index
    %c0_148 = arith.constant 0 : index
    %c0_149 = arith.constant 0 : index
    %261 = vector.load %arg6[%c3_147, %c0_148, %c0_149] : memref<4x8x1xf32, #tpu.memory_space<vmem>>, vector<1x8x1xf32>
    %262 = vector.shape_cast %261 : vector<1x8x1xf32> to vector<8x1xf32>
    %cst_150 = arith.constant dense<0.000000e+00> : vector<16xf32>
    %263 = vector.multi_reduction <add>, %258, %cst_150 [0] : vector<8x16xf32> to vector<16xf32>
    %264 = vector.shape_cast %263 : vector<16xf32> to vector<1x16xf32>
    %cst_151 = arith.constant 8.000000e+00 : f32
    %265 = vector.broadcast %cst_151 : f32 to vector<1x16xf32>
    %266 = arith.divf %264, %265 : vector<1x16xf32>
    %267 = vector.broadcast %266 : vector<1x16xf32> to vector<8x16xf32>
    %268 = arith.subf %258, %267 : vector<8x16xf32>
    %269 = arith.mulf %268, %268 : vector<8x16xf32>
    %cst_152 = arith.constant dense<0.000000e+00> : vector<16xf32>
    %270 = vector.multi_reduction <add>, %269, %cst_152 [0] : vector<8x16xf32> to vector<16xf32>
    %271 = vector.shape_cast %270 : vector<16xf32> to vector<1x16xf32>
    %cst_153 = arith.constant 8.000000e+00 : f32
    %272 = vector.broadcast %cst_153 : f32 to vector<1x16xf32>
    %273 = arith.divf %271, %272 : vector<1x16xf32>
    %cst_154 = arith.constant 9.99999974E-6 : f32
    %274 = vector.broadcast %cst_154 : f32 to vector<1x16xf32>
    %275 = arith.addf %273, %274 : vector<1x16xf32>
    %276 = math.rsqrt %275 : vector<1x16xf32>
    %277 = vector.broadcast %276 : vector<1x16xf32> to vector<8x16xf32>
    %278 = arith.mulf %268, %277 : vector<8x16xf32>
    %279 = vector.broadcast %260 : vector<8x1xf32> to vector<8x16xf32>
    %280 = arith.mulf %278, %279 : vector<8x16xf32>
    %281 = vector.broadcast %262 : vector<8x1xf32> to vector<8x16xf32>
    %282 = arith.addf %280, %281 : vector<8x16xf32>
    %c3_155 = arith.constant 3 : index
    %c0_156 = arith.constant 0 : index
    %c0_157 = arith.constant 0 : index
    %283 = vector.load %arg7[%c3_155, %c0_156, %c0_157] : memref<4x8x8xf32, #tpu.memory_space<vmem>>, vector<1x8x8xf32>
    %284 = vector.shape_cast %283 : vector<1x8x8xf32> to vector<8x8xf32>
    %cst_158 = arith.constant dense<0.000000e+00> : vector<8x16xf32>
    %285 = tpu.matmul %284, %282, %cst_158 {dimension_numbers = #tpu.dot_dimension_numbers<[1], [0], [0], [1], [0, 0, 1, 1], [], []>} : vector<8x8xf32>, vector<8x16xf32>, vector<8x16xf32> -> vector<8x16xf32>
    %286 = arith.addf %258, %285 : vector<8x16xf32>
    %c3_159 = arith.constant 3 : index
    %c0_160 = arith.constant 0 : index
    %c0_161 = arith.constant 0 : index
    %287 = vector.load %arg8[%c3_159, %c0_160, %c0_161] : memref<4x8x1xf32, #tpu.memory_space<vmem>>, vector<1x8x1xf32>
    %288 = vector.shape_cast %287 : vector<1x8x1xf32> to vector<8x1xf32>
    %289 = vector.broadcast %288 : vector<8x1xf32> to vector<8x16xf32>
    %290 = arith.addf %286, %289 : vector<8x16xf32>
    %c3_162 = arith.constant 3 : index
    %c0_163 = arith.constant 0 : index
    %c0_164 = arith.constant 0 : index
    %291 = vector.load %arg9[%c3_162, %c0_163, %c0_164] : memref<4x8x1xf32, #tpu.memory_space<vmem>>, vector<1x8x1xf32>
    %292 = vector.shape_cast %291 : vector<1x8x1xf32> to vector<8x1xf32>
    %c3_165 = arith.constant 3 : index
    %c0_166 = arith.constant 0 : index
    %c0_167 = arith.constant 0 : index
    %293 = vector.load %arg10[%c3_165, %c0_166, %c0_167] : memref<4x8x1xf32, #tpu.memory_space<vmem>>, vector<1x8x1xf32>
    %294 = vector.shape_cast %293 : vector<1x8x1xf32> to vector<8x1xf32>
    %cst_168 = arith.constant dense<0.000000e+00> : vector<16xf32>
    %295 = vector.multi_reduction <add>, %290, %cst_168 [0] : vector<8x16xf32> to vector<16xf32>
    %296 = vector.shape_cast %295 : vector<16xf32> to vector<1x16xf32>
    %cst_169 = arith.constant 8.000000e+00 : f32
    %297 = vector.broadcast %cst_169 : f32 to vector<1x16xf32>
    %298 = arith.divf %296, %297 : vector<1x16xf32>
    %299 = vector.broadcast %298 : vector<1x16xf32> to vector<8x16xf32>
    %300 = arith.subf %290, %299 : vector<8x16xf32>
    %301 = arith.mulf %300, %300 : vector<8x16xf32>
    %cst_170 = arith.constant dense<0.000000e+00> : vector<16xf32>
    %302 = vector.multi_reduction <add>, %301, %cst_170 [0] : vector<8x16xf32> to vector<16xf32>
    %303 = vector.shape_cast %302 : vector<16xf32> to vector<1x16xf32>
    %cst_171 = arith.constant 8.000000e+00 : f32
    %304 = vector.broadcast %cst_171 : f32 to vector<1x16xf32>
    %305 = arith.divf %303, %304 : vector<1x16xf32>
    %cst_172 = arith.constant 9.99999974E-6 : f32
    %306 = vector.broadcast %cst_172 : f32 to vector<1x16xf32>
    %307 = arith.addf %305, %306 : vector<1x16xf32>
    %308 = math.rsqrt %307 : vector<1x16xf32>
    %309 = vector.broadcast %308 : vector<1x16xf32> to vector<8x16xf32>
    %310 = arith.mulf %300, %309 : vector<8x16xf32>
    %311 = vector.broadcast %292 : vector<8x1xf32> to vector<8x16xf32>
    %312 = arith.mulf %310, %311 : vector<8x16xf32>
    %313 = vector.broadcast %294 : vector<8x1xf32> to vector<8x16xf32>
    %314 = arith.addf %312, %313 : vector<8x16xf32>
    %c3_173 = arith.constant 3 : index
    %c0_174 = arith.constant 0 : index
    %c0_175 = arith.constant 0 : index
    %315 = vector.load %arg11[%c3_173, %c0_174, %c0_175] : memref<4x32x8xf32, #tpu.memory_space<vmem>>, vector<1x32x8xf32>
    %316 = vector.shape_cast %315 : vector<1x32x8xf32> to vector<32x8xf32>
    %cst_176 = arith.constant dense<0.000000e+00> : vector<32x16xf32>
    %317 = tpu.matmul %316, %314, %cst_176 {dimension_numbers = #tpu.dot_dimension_numbers<[1], [0], [0], [1], [0, 0, 1, 1], [], []>} : vector<32x8xf32>, vector<8x16xf32>, vector<32x16xf32> -> vector<32x16xf32>
    %c3_177 = arith.constant 3 : index
    %c0_178 = arith.constant 0 : index
    %c0_179 = arith.constant 0 : index
    %318 = vector.load %arg12[%c3_177, %c0_178, %c0_179] : memref<4x32x1xf32, #tpu.memory_space<vmem>>, vector<1x32x1xf32>
    %319 = vector.shape_cast %318 : vector<1x32x1xf32> to vector<32x1xf32>
    %320 = vector.broadcast %319 : vector<32x1xf32> to vector<32x16xf32>
    %321 = arith.addf %317, %320 : vector<32x16xf32>
    %cst_180 = arith.constant 5.000000e-01 : f32
    %322 = vector.broadcast %cst_180 : f32 to vector<32x16xf32>
    %323 = arith.mulf %322, %321 : vector<32x16xf32>
    %cst_181 = arith.constant 4.471500e-02 : f32
    %324 = vector.broadcast %cst_181 : f32 to vector<32x16xf32>
    %325 = arith.mulf %324, %321 : vector<32x16xf32>
    %326 = arith.mulf %325, %321 : vector<32x16xf32>
    %327 = arith.mulf %326, %321 : vector<32x16xf32>
    %328 = arith.addf %321, %327 : vector<32x16xf32>
    %cst_182 = arith.constant 0.797884583 : f32
    %329 = vector.broadcast %cst_182 : f32 to vector<32x16xf32>
    %330 = arith.mulf %329, %328 : vector<32x16xf32>
    %331 = math.tanh %330 : vector<32x16xf32>
    %cst_183 = arith.constant 1.000000e+00 : f32
    %332 = vector.broadcast %cst_183 : f32 to vector<32x16xf32>
    %333 = arith.addf %332, %331 : vector<32x16xf32>
    %334 = arith.mulf %323, %333 : vector<32x16xf32>
    %c3_184 = arith.constant 3 : index
    %c0_185 = arith.constant 0 : index
    %c0_186 = arith.constant 0 : index
    %335 = vector.load %arg13[%c3_184, %c0_185, %c0_186] : memref<4x8x32xf32, #tpu.memory_space<vmem>>, vector<1x8x32xf32>
    %336 = vector.shape_cast %335 : vector<1x8x32xf32> to vector<8x32xf32>
    %cst_187 = arith.constant dense<0.000000e+00> : vector<8x16xf32>
    %337 = tpu.matmul %336, %334, %cst_187 {dimension_numbers = #tpu.dot_dimension_numbers<[1], [0], [0], [1], [0, 0, 1, 1], [], []>} : vector<8x32xf32>, vector<32x16xf32>, vector<8x16xf32> -> vector<8x16xf32>
    %338 = arith.addf %290, %337 : vector<8x16xf32>
    %c3_188 = arith.constant 3 : index
    %c0_189 = arith.constant 0 : index
    %c0_190 = arith.constant 0 : index
    %339 = vector.load %arg14[%c3_188, %c0_189, %c0_190] : memref<4x8x1xf32, #tpu.memory_space<vmem>>, vector<1x8x1xf32>
    %340 = vector.shape_cast %339 : vector<1x8x1xf32> to vector<8x1xf32>
    %341 = vector.broadcast %340 : vector<8x1xf32> to vector<8x16xf32>
    %342 = arith.addf %338, %341 : vector<8x16xf32>
    %343 = tpu.iota {dimensions = array<i32: 1>} : vector<16x32xi32>
    %344 = tpu.iota {dimensions = array<i32: 0>} : vector<16x32xi32>
    %c2_i32 = arith.constant 2 : i32
    %345 = vector.broadcast %c2_i32 : i32 to vector<16x32xi32>
    %346 = arith.muli %344, %345 : vector<16x32xi32>
    %347 = arith.cmpi sge, %343, %346 : vector<16x32xi32>
    %c1_i32 = arith.constant 1 : i32
    %348 = vector.broadcast %c1_i32 : i32 to vector<16x32xi32>
    %349 = arith.addi %344, %348 : vector<16x32xi32>
    %c2_i32_191 = arith.constant 2 : i32
    %350 = vector.broadcast %c2_i32_191 : i32 to vector<16x32xi32>
    %351 = arith.muli %349, %350 : vector<16x32xi32>
    %352 = arith.cmpi slt, %343, %351 : vector<16x32xi32>
    %353 = arith.andi %347, %352 : vector<16x32xi1>
    %354 = arith.extui %353 : vector<16x32xi1> to vector<16x32xi32>
    %355 = arith.sitofp %354 : vector<16x32xi32> to vector<16x32xf32>
    %cst_192 = arith.constant dense<0.000000e+00> : vector<8x32xf32>
    %356 = tpu.matmul %342, %355, %cst_192 {dimension_numbers = #tpu.dot_dimension_numbers<[1], [0], [0], [1], [0, 0, 1, 1], [], []>} : vector<8x16xf32>, vector<16x32xf32>, vector<8x32xf32> -> vector<8x32xf32>
    %c0_193 = arith.constant 0 : index
    %c0_194 = arith.constant 0 : index
    %c0_195 = arith.constant 0 : index
    %357 = vector.load %arg15[%c0_193, %c0_194, %c0_195] : memref<1x8x32xf32, #tpu.memory_space<vmem>>, vector<1x8x32xf32>
    %358 = vector.shape_cast %357 : vector<1x8x32xf32> to vector<8x32xf32>
    %359 = vector.shape_cast %356 : vector<8x32xf32> to vector<1x8x32xf32>
    tpu.vector_store %arg15[%c0_193, %c0_194, %c0_195], %359 {strides = array<i32>} : memref<1x8x32xf32, #tpu.memory_space<vmem>>, vector<1x8x32xf32>,
    return
  }
  func.func @transform_0(%arg0: i32, %arg1: i32) -> (i32, i32, i32) {
    %c0_i32 = arith.constant 0 : i32
    %c0_i32_0 = arith.constant 0 : i32
    return %arg0, %c0_i32, %arg1 : i32, i32, i32
  }
  func.func @transform_1(%arg0: i32, %arg1: i32) -> (i32, i32) {
    %c0_i32 = arith.constant 0 : i32
    %c0_i32_0 = arith.constant 0 : i32
    %c0_i32_1 = arith.constant 0 : i32
    return %c0_i32, %c0_i32_0 : i32, i32
  }
  func.func @transform_2(%arg0: i32, %arg1: i32) -> (i32, i32) {
    %c0_i32 = arith.constant 0 : i32
    %c0_i32_0 = arith.constant 0 : i32
    %c0_i32_1 = arith.constant 0 : i32
    return %c0_i32, %c0_i32_0 : i32, i32
  }
  func.func @transform_3(%arg0: i32, %arg1: i32) -> (i32, i32, i32) {
    %c0_i32 = arith.constant 0 : i32
    %c0_i32_0 = arith.constant 0 : i32
    %c0_i32_1 = arith.constant 0 : i32
    %c0_i32_2 = arith.constant 0 : i32
    return %c0_i32, %c0_i32_0, %c0_i32_1 : i32, i32, i32
  }
  func.func @transform_4(%arg0: i32, %arg1: i32) -> (i32, i32, i32) {
    %c0_i32 = arith.constant 0 : i32
    %c0_i32_0 = arith.constant 0 : i32
    %c0_i32_1 = arith.constant 0 : i32
    %c0_i32_2 = arith.constant 0 : i32
    return %c0_i32, %c0_i32_0, %c0_i32_1 : i32, i32, i32
  }
  func.func @transform_5(%arg0: i32, %arg1: i32) -> (i32, i32, i32) {
    %c0_i32 = arith.constant 0 : i32
    %c0_i32_0 = arith.constant 0 : i32
    %c0_i32_1 = arith.constant 0 : i32
    %c0_i32_2 = arith.constant 0 : i32
    return %c0_i32, %c0_i32_0, %c0_i32_1 : i32, i32, i32
  }
  func.func @transform_6(%arg0: i32, %arg1: i32) -> (i32, i32, i32) {
    %c0_i32 = arith.constant 0 : i32
    %c0_i32_0 = arith.constant 0 : i32
    %c0_i32_1 = arith.constant 0 : i32
    %c0_i32_2 = arith.constant 0 : i32
    return %c0_i32, %c0_i32_0, %c0_i32_1 : i32, i32, i32
  }
  func.func @transform_7(%arg0: i32, %arg1: i32) -> (i32, i32, i32) {
    %c0_i32 = arith.constant 0 : i32
    %c0_i32_0 = arith.constant 0 : i32
    %c0_i32_1 = arith.constant 0 : i32
    %c0_i32_2 = arith.constant 0 : i32
    return %c0_i32, %c0_i32_0, %c0_i32_1 : i32, i32, i32
  }
  func.func @transform_8(%arg0: i32, %arg1: i32) -> (i32, i32, i32) {
    %c0_i32 = arith.constant 0 : i32
    %c0_i32_0 = arith.constant 0 : i32
    %c0_i32_1 = arith.constant 0 : i32
    %c0_i32_2 = arith.constant 0 : i32
    return %c0_i32, %c0_i32_0, %c0_i32_1 : i32, i32, i32
  }
  func.func @transform_9(%arg0: i32, %arg1: i32) -> (i32, i32, i32) {
    %c0_i32 = arith.constant 0 : i32
    %c0_i32_0 = arith.constant 0 : i32
    %c0_i32_1 = arith.constant 0 : i32
    %c0_i32_2 = arith.constant 0 : i32
    return %c0_i32, %c0_i32_0, %c0_i32_1 : i32, i32, i32
  }
  func.func @transform_10(%arg0: i32, %arg1: i32) -> (i32, i32, i32) {
    %c0_i32 = arith.constant 0 : i32
    %c0_i32_0 = arith.constant 0 : i32
    %c0_i32_1 = arith.constant 0 : i32
    %c0_i32_2 = arith.constant 0 : i32
    return %c0_i32, %c0_i32_0, %c0_i32_1 : i32, i32, i32
  }
  func.func @transform_11(%arg0: i32, %arg1: i32) -> (i32, i32, i32) {
    %c0_i32 = arith.constant 0 : i32
    %c0_i32_0 = arith.constant 0 : i32
    %c0_i32_1 = arith.constant 0 : i32
    %c0_i32_2 = arith.constant 0 : i32
    return %c0_i32, %c0_i32_0, %c0_i32_1 : i32, i32, i32
  }
  func.func @transform_12(%arg0: i32, %arg1: i32) -> (i32, i32, i32) {
    %c0_i32 = arith.constant 0 : i32
    %c0_i32_0 = arith.constant 0 : i32
    %c0_i32_1 = arith.constant 0 : i32
    %c0_i32_2 = arith.constant 0 : i32
    return %c0_i32, %c0_i32_0, %c0_i32_1 : i32, i32, i32
  }
  func.func @transform_13(%arg0: i32, %arg1: i32) -> (i32, i32, i32) {
    %c0_i32 = arith.constant 0 : i32
    %c0_i32_0 = arith.constant 0 : i32
    return %arg0, %c0_i32, %arg1 : i32, i32, i32
  }
}

</mosaic_0001>

<bundles_post_ra>
// kernel: tpu_custom_call.1
= control target key start
LH: loop header
LB: loop body
LE: loop exit
PB: predicated region body
PF: predicated region fallthrough
CT: control target
= control target key end

     0   :  { %s3302_s0 = inlined_call_operand.vmem [shape: f32[2,16,16], index: 0, kind: input, shape index: {}]   ;;  %s3303_s1 = inlined_call_operand.vmem [shape: f32[8,16], index: 1, kind: input, shape index: {}]   ;;  %s3304_s2 = inlined_call_operand.vmem [shape: f32[8,1], index: 2, kind: input, shape index: {}]   ;;  %s3305_s3 = inlined_call_operand.vmem [shape: f32[4,8,1], index: 3, kind: input, shape index: {}]   ;;  %s3306_s4 = inlined_call_operand.vmem [shape: f32[4,8,1], index: 4, kind: input, shape index: {}]   ;;  %s3307_s5 = inlined_call_operand.vmem [shape: f32[4,8,8], index: 5, kind: input, shape index: {}]   ;;  %s3308_s6 = inlined_call_operand.vmem [shape: f32[4,8,1], index: 6, kind: input, shape index: {}]   ;;  %s3309_s7 = inlined_call_operand.vmem [shape: f32[4,8,1], index: 7, kind: input, shape index: {}]   ;;  %s3310_s8 = inlined_call_operand.vmem [shape: f32[4,8,1], index: 8, kind: input, shape index: {}]   ;;  %s3311_s9 = inlined_call_operand.vmem [shape: f32[4,32,8], index: 9, kind: input, shape index: {}]   ;;  %s3312_s10 = inlined_call_operand.vmem [shape: f32[4,32,1], index: 10, kind: input, shape index: {}]   ;;  %s3313_s11 = inlined_call_operand.vmem [shape: f32[4,8,32], index: 11, kind: input, shape index: {}]   ;;  %s3314_s12 = inlined_call_operand.vmem [shape: f32[4,8,1], index: 12, kind: input, shape index: {}]   ;;  %s3315_s13 = inlined_call_operand.hbm [shape: f32[2,8,32], index: 13, kind: output, shape index: {}]  }
   0x1   :  { %3318 = sst [smem:[#allocation7_spill]] %s3304_s2 }
   0x2   :  { %18 = vsyncpa [#allocation3], 0 }
   0x3   :  { %20 = vsyncpa [#allocation3 + $0x1], 0  ;;  %s2895_s25 = smov 0   ;;  %s2897_s26 = smov 0  }
   0x4   :  { %s2899_s27 = smov 0   ;;  %s2901_s28 = smov 0  }
   0x5   :  { %s2903_s29 = smov 0   ;;  %s2905_s30 = smov 0  }
   0x6 LB: > { %3319 = sst [smem:[#allocation5_spill]] %s2813_s29  ;;  %s2344_s14 = sadd.s32 4294967295, %s2817_s30   ;;  %s2817_s30 = sphi %s2905_s30, %s26_s30   ;;  %s2813_s29 = sphi %s2903_s29, %s3325_s29   ;;  %s2809_s28 = sphi %s2901_s28, %s3324_s28   ;;  %s2805_s27 = sphi %s2899_s27, %s3328_s27   ;;  %s2801_s26 = sphi %s2897_s26, %s3327_s26   ;;  %s2797_s25 = sphi %s2895_s25, %s3326_s25  }
   0x7   : > { %s2345_s15 = sadd.s32 4294967294, %s2817_s30   ;;  %s38_s16 = sadd.s32 1, %s2813_s29 }
   0x8   : > { %s327_s17 = sadd.s32 1, %s2805_s27  ;;  %p40_p0 = scmp.ge.s32.totalorder %s38_s16, 2 }
   0x9   : > { %p337_p1 = scmp.ne.s32.totalorder %s2805_s27, %s2801_s26  ;;  %p338_p2 = scmp.eq.s32.totalorder %s2344_s14, 1 }
   0xa   : > { %p343_p3 = scmp.ne.s32.totalorder %s2801_s26, %s2797_s25  ;;  %s3330_s16 = smov (%p40_p0, %s38_s16), 0 }
   0xb   : > { %3320 = sst [smem:[#allocation6_spill]] %s3330_s16  ;;  %p2935_p4 = por %p338_p2, %p337_p1 }
   0xc   : > { %p344_p5 = scmp.eq.s32.totalorder %s2345_s15, 1  ;;  %s322_s19 = ssub.s32 %s2813_s29, %s3330_s16 }
   0xd   : > { %p2348_p6 = scmp.ge.s32.totalorder %s2817_s30, 1  ;;  %p325_p7 = scmp.eq.s32.totalorder %s322_s19, 0 }
   0xe   : > { %p2942_p8 = por %p344_p5, %p343_p3  ;;  %p409_p9 = scmp.lt.s32.totalorder %s2817_s30, 3 }
   0xf   : > { %s2948_s21 = scalar_select %p325_p7, %s2805_s27, %s327_s17  }
  0x10   : > { %p410_p10 = pnand %p2348_p6, %p409_p9 }
  0x11   : > { %p456_p11 = scmp.lt.s32.totalorder (!%p410_p10), %s2809_s28, 1  ;;  %v2819_v0 = vmov (!%p410_p10), 0.0|0.0   ;;  %vm2820_vm0 = vmmov (!%p410_p10), 0   ;;  %v2821_v1 = vmov (!%p410_p10), 0.0   ;;  %s3323_s2 = sld [smem:[#allocation7_spill]] (!%p410_p10)  ;;  %v2822_v3 = vmov (!%p410_p10), 0  }
  0x12   : > { %413 = sbr.rel (%p410_p10) target bundleno = 3635 (0xe33), region = 72  ;;  %2599 = vmatprep.subr.bf16.mxu0 (!%p410_p10), %v2819_v0  ;;  %2493 = vmatprep.mubr.msk.f32.mxu0 (!%p410_p10), %vm2820_vm0, %v2821_v1  ;;  %v547_v4 = vld [vmem:[%s3305_s3] sm:$0xff] (!%p410_p10)  ;;  %vm473_vm1 = vcmask (!%p410_p10), 130048   ;;  %v707_v14 = vld [vmem:[%s3312_s10 + $0x10] sm:$0xff] (!%p410_p10)  ;;  %v706_v15 = vld [vmem:[%s3312_s10 + $0x8] sm:$0xff] (!%p410_p10)  ;;  %vm584_vm2 = vcmask (!%p410_p10), 64512  }
  0x13   : > { %2689 = vset.pattern.permute.xlu0 (!%p410_p10), %v2822_v3  ;;  %2690 = vset.pattern.permute.xlu1 (!%p410_p10), %v2822_v3  ;;  %v548_v7 = vld [vmem:[%s3306_s4] sm:$0xff] (!%p410_p10)  ;;  %v708_v17 = vld [vmem:[%s3312_s10 + $0x18] sm:$0xff] (!%p410_p10)  ;;  %v2360_v18 = vld [vmem:[%s3306_s4 + $0x8] sm:$0xff] (!%p410_p10)  ;;  %vm863_vm3 = vcmask (!%p410_p10), 261120   ;;  %s2431_s29 = sshll.u32 (!%p410_p10), %s2809_s28, 7 }
  0x14   : > { %2496 = vmatprep.subr.mxu1 (!%p410_p10), %v2821_v1  ;;  %2498 = vmatprep.mubr.msk.f32.mxu1 (!%p410_p10), %vm2820_vm0, %v2821_v1  ;;  %v666_v9 = vld [vmem:[%s3309_s7] sm:$0xff] (!%p410_p10)  ;;  %v2359_v19 = vld [vmem:[%s3305_s3 + $0x8] sm:$0xff] (!%p410_p10)  ;;  %v2372_v24 = vld [vmem:[%s3312_s10 + $0x30] sm:$0xff] (!%p410_p10)  ;;  %s3254_s17 = scalar_lea.hbm (!%p410_p10), %s3315_s13, %s2431_s29 }
  0x15   : > { %579 = vperm.xlu1 (!%p410_p10), %2690, %v548_v7   ;;  %v659_v10 = vld [vmem:[%s3308_s6] sm:$0xff] (!%p410_p10)  ;;  %v2364_v20 = vld [vmem:[%s3309_s7 + $0x8] sm:$0xff] (!%p410_p10)  ;;  %v2373_v27 = vld [vmem:[%s3312_s10 + $0x38] sm:$0xff] (!%p410_p10) }
  0x16   : > { %v464_v11 = vld [vmem:[%s3303_s1] sm:$0xff] (!%p410_p10)  ;;  %v2363_v21 = vld [vmem:[%s3308_s6 + $0x8] sm:$0xff] (!%p410_p10)  ;;  %v2382_v28 = vld [vmem:[%s3306_s4 + $0x10] sm:$0xff] (!%p410_p10) }
  0x17   : > { %v467_v2 = vld [vmem:[%s3323_s2] sm:$0xff] (!%p410_p10)  ;;  %v2365_v23 = vld [vmem:[%s3310_s8 + $0x8] sm:$0xff] (!%p410_p10)  ;;  %v2381_v29 = vld [vmem:[%s3305_s3 + $0x10] sm:$0xff] (!%p410_p10)  ;;  %s453_s2 = sand.u32 (!%p410_p10), 1, %s2801_s26  }
  0x18   : > { %470 = vperm.xlu0 (!%p410_p10), %2689, %v467_v2   ;;  %v705_v12 = vld [vmem:[%s3312_s10] sm:$0xff] (!%p410_p10)  ;;  %v2371_v25 = vld [vmem:[%s3312_s10 + $0x28] sm:$0xff] (!%p410_p10)  ;;  %v2386_v30 = vld [vmem:[%s3309_s7 + $0x10] sm:$0xff] (!%p410_p10)  ;;  %s2349_s19 = sshll.u32 (!%p410_p10), %s453_s2, 3  ;;  %s2256_s16 = scalar_lea.sflag (!%p410_p10), [#allocation3], %s453_s2 }
  0x19   : > { %s457_s24 = scalar_select %p456_p11, %s2809_s28, 1  ;;  %662 = vperm.xlu1 %2690, %v659_v10   ;;  %v667_v13 = vld [vmem:[%s3310_s8] sm:$0xff]  ;;  %v2380_v26 = vld [vmem:[%s3314_s12 + $0x8] sm:$0xff]  ;;  %v2385_v31 = vld [vmem:[%s3308_s6 + $0x10] sm:$0xff] }
  0x1a   : > { %v938_v16 = vld [vmem:[%s3314_s12] sm:$0xff]  ;;  %v2387_v33 = vld [vmem:[%s3310_s8 + $0x10] sm:$0xff]  ;;  %v2393_v35 = vld [vmem:[%s3312_s10 + $0x48] sm:$0xff]  ;;  %s2824_s28 = smov [#allocation2]  }
  0x1b   : > { %s2434_s14 = sshll.u32 %s457_s24, 4  ;;  %v2370_v22 = vld [vmem:[%s3312_s10 + $0x20] sm:$0xff]  ;;  %v2394_v34 = vld [vmem:[%s3312_s10 + $0x50] sm:$0xff]  ;;  %v2395_v37 = vld [vmem:[%s3312_s10 + $0x58] sm:$0xff] }
  0x1c   : > { %s463_s22 = scalar_lea.vmem %s3302_s0, %s2434_s14  ;;  %573 = vperm.xlu0 %2689, %v547_v4   ;;  %v2392_v32 = vld [vmem:[%s3312_s10 + $0x40] sm:$0xff]  ;;  %v2402_v36 = vld [vmem:[%s3314_s12 + $0x10] sm:$0xff]  ;;  %v2404_v38 = vld [vmem:[%s3306_s4 + $0x18] sm:$0xff] }
  0x1d   : > { %v465_v5 = vld [vmem:[%s463_s22] sm:$0xff]  ;;  %v466_v6 = vld [vmem:[%s463_s22 + $0x8] sm:$0xff]  ;;  %697 = vperm.xlu1 %2690, %v667_v13   ;;  %v2403_v39 = vld [vmem:[%s3305_s3 + $0x18] sm:$0xff]  ;;  %s455_s22 = scalar_lea.vmem [#allocation2], %s2349_s19  ;;  %s2743_s19 = sshll.u32 %s2824_s28, 4  ;;  %s2744_s19 = int_to_ptr.vmem [resolvable:$false] %s2743_s19 }
  0x1e   : > { %v2600_v8 = vpack.c.bf16 %v466_v6, %v465_v5  ;;  %v2408_v40 = vld [vmem:[%s3309_s7 + $0x18] sm:$0xff]  ;;  %v2414_v42 = vld [vmem:[%s3312_s10 + $0x60] sm:$0xff]  ;;  %v2416_v44 = vld [vmem:[%s3312_s10 + $0x70] sm:$0xff]  ;;  %s2270_s23 = sshll.u32 %s455_s22, 4  ;;  %s2745_s29 = scalar_lea.vmem %s2744_s19, 256  ;;  %s3256_s23 = int_to_ptr.vmem [resolvable:$true] %s2270_s23 }
  0x1f   : > { %v2407_v41 = vld [vmem:[%s3308_s6 + $0x18] sm:$0xff]  ;;  %v2415_v45 = vld [vmem:[%s3312_s10 + $0x68] sm:$0xff]  ;;  %s2739_s14 = scalar_lea.vmem %s3256_s23, 128  ;;  %p2746_p1 = scmp.lt.s32.totalorder %s3256_s23, %s2744_s19 }
  0x20   : > { %2601 = vmatpush3.bf16.msra.mxu0 %v2600_v8  ;;  %691 = vperm.xlu0 %2689, %v666_v9   ;;  %v2409_v43 = vld [vmem:[%s3310_s8 + $0x18] sm:$0xff]  ;;  %p2740_p12 = scmp.ne.s32.totalorder %s3256_s23, %s2739_s14  ;;  %p2747_p2 = scmp.lt.s32.totalorder %s2745_s29, %s2739_s14 }
  0x21   : > { %2602 = vmatprep.subr.bf16.mxu0 %v2819_v0  ;;  %716 = vperm.xlu1 %2690, %v706_v15   ;;  %v2424_v46 = vld [vmem:[%s3314_s12 + $0x18] sm:$0xff]  ;;  %v583_v15 = vld [vmem:[%s3307_s5] sm:$0xff] }
  0x22   : > { %v2417_v47 = vld [vmem:[%s3312_s10 + $0x78] sm:$0xff]  ;;  %p2741_p13 = pnand %p2740_p12, %p2935_p4  ;;  %p2748_p3 = por %p2747_p2, %p2746_p1 }
  0x23   : > { %2494 = vmatmul.mubr.msk.f32.vlgmr.msra.gmra.mrb[0].mxu0 %vm473_vm1, %v464_v11 }
  0x24   : > { %2517 = vmatprep.mubr.msk.f32.mxu0 %vm2820_vm0, %v2821_v1  ;;  %711 = vperm.xlu0 %2689, %v705_v12   ;;  %p2742_p0 = pneg %p2741_p13 }
  0x25   : > { %726 = vperm.xlu1 %2690, %v708_v17  }
  0x26   : > { %p2749_p5 = pnand %p2748_p3, %p2742_p0 }
  0x28   : > { %721 = vperm.xlu0 %2689, %v707_v14  }
  0x29   : > { %972 = vperm.xlu1 %2690, %v2359_v19  }
  0x2c   : > { %941 = vperm.xlu0 %2689, %v938_v16   ;;  %v701_v16 = vld [vmem:[%s3311_s9] sm:$0xff] }
  0x2d   : > { %1062 = vperm.xlu1 %2690, %v2363_v21  }
  0x30   : > { %978 = vperm.xlu0 %2689, %v2360_v18  }
  0x31   : > { %1099 = vperm.xlu1 %2690, %v2365_v23  }
  0x34   : > { %1093 = vperm.xlu0 %2689, %v2364_v20  }
  0x35   : > { %1120 = vperm.xlu1 %2690, %v2371_v25  }
  0x38   : > { %1115 = vperm.xlu0 %2689, %v2370_v22  }
  0x39   : > { %1130 = vperm.xlu1 %2690, %v2373_v27  }
  0x3c   : > { %1125 = vperm.xlu0 %2689, %v2372_v24  }
  0x3d   : > { %1377 = vperm.xlu1 %2690, %v2381_v29  }
  0x40   : > { %1346 = vperm.xlu0 %2689, %v2380_v26  }
  0x41   : > { %1467 = vperm.xlu1 %2690, %v2385_v31  }
  0x44   : > { %1383 = vperm.xlu0 %2689, %v2382_v28  }
  0x45   : > { %1504 = vperm.xlu1 %2690, %v2387_v33  }
  0x48   : > { %1498 = vperm.xlu0 %2689, %v2386_v30  }
  0x49   : > { %1525 = vperm.xlu1 %2690, %v2393_v35  }
  0x4c   : > { %1520 = vperm.xlu0 %2689, %v2392_v32  }
  0x4d   : > { %1535 = vperm.xlu1 %2690, %v2395_v37  }
  0x50   : > { %1530 = vperm.xlu0 %2689, %v2394_v34  }
  0x51   : > { %1782 = vperm.xlu1 %2690, %v2403_v39  }
  0x54   : > { %1751 = vperm.xlu0 %2689, %v2402_v36  }
  0x55   : > { %1872 = vperm.xlu1 %2690, %v2407_v41  }
  0x58   : > { %1788 = vperm.xlu0 %2689, %v2404_v38  }
  0x59   : > { %1909 = vperm.xlu1 %2690, %v2409_v43  }
  0x5c   : > { %1903 = vperm.xlu0 %2689, %v2408_v40  }
  0x5d   : > { %1930 = vperm.xlu1 %2690, %v2415_v45  }
  0x60   : > { %1925 = vperm.xlu0 %2689, %v2414_v42  }
  0x61   : > { %1940 = vperm.xlu1 %2690, %v2417_v47   ;;  %v702_v47 = vld [vmem:[%s3311_s9 + $0x8] sm:$0xff] }
  0x64   : > { %1935 = vperm.xlu0 %2689, %v2416_v44  }
  0x68   : > { %2156 = vperm.xlu0 %2689, %v2424_v46  }
  0x94   : > { %v580_v13 = vpop.permute.xlu1 %579 }
  0x97   : > { %v471_v48 = vpop.permute.xlu0 %470 }
  0x98   : > { %v663_v20 = vpop.permute.xlu1 %662 }
  0x9b   : > { %v574_v11 = vpop.permute.xlu0 %573 }
  0x9c   : > { %v698_v45 = vpop.permute.xlu1 %697 }
  0x9f   : > { %v692_v43 = vpop.permute.xlu0 %691 }
  0xf6   : > { %v543_v49 = vpop.f32.mrb[0].mxu0 }
  0xf7   : > { %v544_v50 = vadd.f32 %v543_v49, %v471_v48  ;;  %v2495_v51 = vpop.f32.mrb[1].mxu0  ;;  %v703_v48 = vld [vmem:[%s3311_s9 + $0x10] sm:$0xff]  ;;  %v704_v49 = vld [vmem:[%s3311_s9 + $0x18] sm:$0xff] }
  0xf8   : > { %v712_v51 = vpop.permute.xlu0 %711 }
  0xf9   : > { %v549_v52 = vsel %vm473_vm1, %v544_v50, 0.0 }
  0xfa   : > { %v550_v53 = vrot.slane %v549_v52, 4 }
  0xfc   : > { %v551_v54 = vadd.f32 %v550_v53, %v549_v52 }
  0xfe   : > { %v552_v55 = vrot.slane %v551_v54, 2 }
 0x100   : > { %v553_v56 = vadd.f32 %v552_v55, %v551_v54 }
 0x102   : > { %v554_v57 = vrot.slane %v553_v56, 1 }
 0x104   : > { %v555_v58 = vadd.f32 %v554_v57, %v553_v56 }
 0x106   : > { %v557_v59 = vmul.f32 0.125, %v555_v58 }
 0x108   : > { %v558_v60 = vsub.f32 %v544_v50, %v557_v59 }
 0x10a   : > { %v559_v61 = vmul.f32 %v558_v60, %v558_v60 }
 0x10c   : > { %v560_v62 = vsel %vm473_vm1, %v559_v61, 0.0 }
 0x10d   : > { %v561_v63 = vrot.slane %v560_v62, 4 }
 0x10f   : > { %v562_v2 = vadd.f32 %v561_v63, %v560_v62 }
 0x111   : > { %v563_v3 = vrot.slane %v562_v2, 2 }
 0x113   : > { %v564_v4 = vadd.f32 %v563_v3, %v562_v2 }
 0x115   : > { %v565_v5 = vrot.slane %v564_v4, 1 }
 0x117   : > { %v566_v6 = vadd.f32 %v565_v5, %v564_v4 }
 0x119   : > { %v567_v7 = vmul.f32 0.125, %v566_v6 }
 0x11b   : > { %v568_v8 = vadd.f32 1e-05, %v567_v7 }
 0x11d   : > { %2691 = vrsqrt.f32 %v568_v8 }
 0x127   : > { %v2692_v9 = vpop.eup %2691 }
 0x128   : > { %v570_v10 = vmul.f32 %v2692_v9, %v558_v60  ;;  %v722_v60 = vpop.permute.xlu0 %721 }
 0x12a   : > { %v576_v12 = vmul.f32 %v574_v11, %v570_v10 }
 0x12c   : > { %v582_v14 = vadd.f32 %v580_v13, %v576_v12 }
 0x12e   : > { %2497 = vmatpush3.msra.mxu1 %v582_v14 }
 0x12f   : > { %2499 = vmatmul.mubr.msk.f32.vlgmr.msra.gmra.mrb[0].mxu1 %vm584_vm2, %v583_v15 }
 0x130   : > { %2503 = vmatprep.mubr.msk.f32.mxu1 %vm584_vm2, %v701_v16 }
 0x202   : > { %v654_v17 = vpop.f32.mrb[0].mxu1 }
 0x203   : > { %v658_v18 = vadd.f32 %v654_v17, %v544_v50  ;;  %v2500_v19 = vpop.f32.mrb[1].mxu1  ;;  %v717_v50 = vpop.permute.xlu1 %716 }
 0x205   : > { %v3101_v21 = vadd.f32 %v663_v20, %v658_v18 }
 0x207   : > { %v668_v22 = vsel %vm473_vm1, %v3101_v21, 0.0  ;;  %v727_v57 = vpop.permute.xlu1 %726 }
 0x208   : > { %v669_v23 = vrot.slane %v668_v22, 4 }
 0x20a   : > { %v670_v24 = vadd.f32 %v669_v23, %v668_v22 }
 0x20c   : > { %v671_v25 = vrot.slane %v670_v24, 2 }
 0x20e   : > { %v672_v26 = vadd.f32 %v671_v25, %v670_v24 }
 0x210   : > { %v673_v27 = vrot.slane %v672_v26, 1 }
 0x212   : > { %v674_v28 = vadd.f32 %v673_v27, %v672_v26 }
 0x214   : > { %v675_v29 = vmul.f32 0.125, %v674_v28 }
 0x216   : > { %v676_v30 = vsub.f32 %v3101_v21, %v675_v29 }
 0x218   : > { %v677_v31 = vmul.f32 %v676_v30, %v676_v30 }
 0x21a   : > { %v678_v32 = vsel %vm473_vm1, %v677_v31, 0.0 }
 0x21b   : > { %v679_v33 = vrot.slane %v678_v32, 4 }
 0x21d   : > { %v680_v34 = vadd.f32 %v679_v33, %v678_v32 }
 0x21f   : > { %v681_v35 = vrot.slane %v680_v34, 2 }
 0x221   : > { %v682_v36 = vadd.f32 %v681_v35, %v680_v34 }
 0x223   : > { %v683_v37 = vrot.slane %v682_v36, 1 }
 0x225   : > { %v684_v38 = vadd.f32 %v683_v37, %v682_v36 }
 0x227   : > { %v685_v39 = vmul.f32 0.125, %v684_v38 }
 0x229   : > { %v686_v40 = vadd.f32 1e-05, %v685_v39  ;;  %v862_v39 = vld [vmem:[%s3313_s11] sm:$0xff] }
 0x22b   : > { %2693 = vrsqrt.f32 %v686_v40 }
 0x235   : > { %v2694_v41 = vpop.eup %2693 }
 0x236   : > { %v688_v42 = vmul.f32 %v2694_v41, %v676_v30 }
 0x238   : > { %v694_v44 = vmul.f32 %v692_v43, %v688_v42  ;;  %v942_v43 = vpop.permute.xlu0 %941 }
 0x23a   : > { %v700_v46 = vadd.f32 %v698_v45, %v694_v44 }
 0x23c   : > { %2501 = vmatprep.subr.mxu1 %v700_v46 }
 0x23d   : > { %2502 = vmatpush3.msra.mxu1 %v700_v46 }
 0x23e   : > { %2504 = vmatmul.mubr.msk.f32.vlgmr.msra.gmra.mrb[2].mxu1 %vm584_vm2, %v702_v47  ;;  %2520 = vmatprep.subr.mxu1 %v2821_v1 }
 0x23f   : > { %2506 = vmatprep.mubr.msk.f32.mxu1 %vm584_vm2, %v703_v48 }
 0x242   : > { %2507 = vmatmul.mubr.msk.f32.gmra.mrb[4].mxu1 %vm584_vm2, %v704_v49 }
 0x243   : > { %2522 = vmatprep.mubr.msk.f32.mxu1 %vm2820_vm0, %v2821_v1 }
 0x311   : > { %v2505_v52 = vpop.f32.mrb[2].mxu1 }
 0x312   : > { %v813_v53 = vadd.f32 %v2505_v52, %v717_v50  ;;  %v807_v54 = vpop.f32.mrb[3].mxu1 }
 0x313   : > { %v808_v55 = vadd.f32 %v807_v54, %v712_v51 }
 0x314   : > { %v831_v56 = vmul.f32 0.044715, %v813_v53  ;;  %v827_v23 = vmul.f32 0.5, %v813_v53 }
 0x315   : > { %v830_v58 = vmul.f32 0.044715, %v808_v55  ;;  %v2508_v59 = vpop.f32.mrb[4].mxu1  ;;  %v826_v25 = vmul.f32 0.5, %v808_v55 }
 0x316   : > { %v835_v61 = vmul.f32 %v831_v56, %v813_v53  ;;  %v823_v62 = vadd.f32 %v2508_v59, %v727_v57  ;;  %v817_v63 = vpop.f32.mrb[5].mxu1 }
 0x317   : > { %v834_v2 = vmul.f32 %v830_v58, %v808_v55  ;;  %v818_v3 = vadd.f32 %v817_v63, %v722_v60 }
 0x318   : > { %v839_v4 = vmul.f32 %v835_v61, %v813_v53  ;;  %v833_v5 = vmul.f32 0.044715, %v823_v62  ;;  %v829_v31 = vmul.f32 0.5, %v823_v62 }
 0x319   : > { %v838_v6 = vmul.f32 %v834_v2, %v808_v55  ;;  %v832_v7 = vmul.f32 0.044715, %v818_v3  ;;  %v828_v34 = vmul.f32 0.5, %v818_v3 }
 0x31a   : > { %v843_v8 = vadd.f32 %v839_v4, %v813_v53  ;;  %v837_v9 = vmul.f32 %v833_v5, %v823_v62  ;;  %v979_v5 = vpop.permute.xlu0 %978 }
 0x31b   : > { %v842_v10 = vadd.f32 %v838_v6, %v808_v55  ;;  %v836_v11 = vmul.f32 %v832_v7, %v818_v3  ;;  %v2361_v7 = vld [vmem:[%s3307_s5 + $0x8] sm:$0xff] }
 0x31c   : > { %v847_v12 = vmul.f32 0.7978846, %v843_v8  ;;  %v841_v13 = vmul.f32 %v837_v9, %v823_v62  ;;  %v2366_v8 = vld [vmem:[%s3311_s9 + $0x20] sm:$0xff] }
 0x31d   : > { %v846_v14 = vmul.f32 0.7978846, %v842_v10  ;;  %v840_v15 = vmul.f32 %v836_v11, %v818_v3 }
 0x31e   : > { %2695 = vtanh.f32 %v847_v12  ;;  %v845_v16 = vadd.f32 %v841_v13, %v823_v62 }
 0x31f   : > { %2697 = vtanh.f32 %v846_v14  ;;  %v844_v17 = vadd.f32 %v840_v15, %v818_v3  ;;  %v973_v3 = vpop.permute.xlu1 %972 }
 0x320   : > { %v849_v18 = vmul.f32 0.7978846, %v845_v16 }
 0x321   : > { %v848_v19 = vmul.f32 0.7978846, %v844_v17 }
 0x322   : > { %2699 = vtanh.f32 %v849_v18 }
 0x323   : > { %2701 = vtanh.f32 %v848_v19  ;;  %v1063_v12 = vpop.permute.xlu1 %1062 }
 0x328   : > { %v2696_v20 = vpop.eup %2695 }
 0x329   : > { %v2698_v22 = vpop.eup %2697  ;;  %v855_v24 = vadd.f32 1.0, %v2696_v20 }
 0x32a   : > { %v854_v26 = vadd.f32 1.0, %v2698_v22 }
 0x32b   : > { %v859_v27 = vmul.f32 %v855_v24, %v827_v23 }
 0x32c   : > { %v2700_v28 = vpop.eup %2699  ;;  %v858_v29 = vmul.f32 %v854_v26, %v826_v25 }
 0x32d   : > { %v2702_v30 = vpop.eup %2701  ;;  %v857_v32 = vadd.f32 1.0, %v2700_v28 }
 0x32e   : > { %v2603_v33 = vpack.c.bf16 %v859_v27, %v858_v29  ;;  %v856_v35 = vadd.f32 1.0, %v2702_v30 }
 0x32f   : > { %v861_v36 = vmul.f32 %v857_v32, %v829_v31 }
 0x330   : > { %2604 = vmatpush3.bf16.msra.mxu0 %v2603_v33  ;;  %v860_v37 = vmul.f32 %v856_v35, %v828_v34 }
 0x331   : > { %2605 = vmatprep.subr.bf16.mxu0 %v2819_v0 }
 0x332   : > { %v2606_v38 = vpack.c.bf16 %v861_v36, %v860_v37  ;;  %v1094_v36 = vpop.permute.xlu0 %1093 }
 0x334   : > { %2607 = vmatpush3.bf16.msra.mxu0 %v2606_v38  ;;  %v1100_v38 = vpop.permute.xlu1 %1099 }
 0x337   : > { %2518 = vmatmul.mubr.msk.f32.vlgmr.msra.gmra.mrb[2].mxu0 %vm863_vm3, %v862_v39 }
 0x338   : > { %2527 = vmatprep.mubr.msk.f32.mxu0 %vm584_vm2, %v2366_v8 }
 0x40a   : > { %v933_v40 = vpop.f32.mrb[2].mxu0 }
 0x40b   : > { %v937_v41 = vadd.f32 %v933_v40, %v3101_v21  ;;  %v2519_v42 = vpop.f32.mrb[3].mxu0  ;;  %v2367_v40 = vld [vmem:[%s3311_s9 + $0x28] sm:$0xff] }
 0x40c   : > { %v2369_v42 = vld [vmem:[%s3311_s9 + $0x38] sm:$0xff] }
 0x40d   : > { %v944_v44 = vadd.f32 %v942_v43, %v937_v41  ;;  %v2368_v41 = vld [vmem:[%s3311_s9 + $0x30] sm:$0xff]  ;;  %v1121_v43 = vpop.permute.xlu1 %1120 }
 0x40f   : > { %v949_v45 = vsel %vm473_vm1, %v944_v44, 0.0 }
 0x410   : > { %v950_v46 = vrot.slane %v949_v45, 4 }
 0x412   : > { %v951_v47 = vadd.f32 %v950_v46, %v949_v45 }
 0x414   : > { %v952_v48 = vrot.slane %v951_v47, 2 }
 0x416   : > { %v953_v49 = vadd.f32 %v952_v48, %v951_v47 }
 0x418   : > { %v954_v50 = vrot.slane %v953_v49, 1 }
 0x41a   : > { %v955_v51 = vadd.f32 %v954_v50, %v953_v49  ;;  %v1131_v50 = vpop.permute.xlu1 %1130 }
 0x41c   : > { %v956_v52 = vmul.f32 0.125, %v955_v51 }
 0x41e   : > { %v957_v53 = vsub.f32 %v944_v44, %v956_v52 }
 0x420   : > { %v958_v54 = vmul.f32 %v957_v53, %v957_v53 }
 0x422   : > { %v959_v55 = vsel %vm473_vm1, %v958_v54, 0.0 }
 0x423   : > { %v960_v56 = vrot.slane %v959_v55, 4 }
 0x425   : > { %v961_v57 = vadd.f32 %v960_v56, %v959_v55 }
 0x427   : > { %v962_v58 = vrot.slane %v961_v57, 2 }
 0x429   : > { %v963_v21 = vadd.f32 %v962_v58, %v961_v57 }
 0x42b   : > { %v964_v59 = vrot.slane %v963_v21, 1 }
 0x42d   : > { %v965_v60 = vadd.f32 %v964_v59, %v963_v21 }
 0x42f   : > { %v966_v61 = vmul.f32 0.125, %v965_v60 }
 0x431   : > { %v967_v62 = vadd.f32 1e-05, %v966_v61 }
 0x433   : > { %2703 = vrsqrt.f32 %v967_v62 }
 0x43d   : > { %v2704_v63 = vpop.eup %2703 }
 0x43e   : > { %v969_v2 = vmul.f32 %v2704_v63, %v957_v53 }
 0x440   : > { %v975_v4 = vmul.f32 %v973_v3, %v969_v2 }
 0x442   : > { %v981_v6 = vadd.f32 %v979_v5, %v975_v4 }
 0x444   : > { %2521 = vmatpush3.msra.mxu1 %v981_v6 }
 0x445   : > { %2523 = vmatmul.mubr.msk.f32.vlgmr.msra.gmra.mrb[6].mxu1 %vm584_vm2, %v2361_v7  ;;  %2608 = vmatprep.subr.bf16.mxu1 %v2819_v0 }
 0x446   : > { %2541 = vmatprep.mubr.msk.f32.mxu1 %vm2820_vm0, %v2821_v1 }
 0x518   : > { %v1053_v9 = vpop.f32.mrb[6].mxu1 }
 0x519   : > { %v1057_v10 = vadd.f32 %v1053_v9, %v944_v44  ;;  %v2524_v11 = vpop.f32.mrb[7].mxu1  ;;  %v1116_v44 = vpop.permute.xlu0 %1115 }
 0x51b   : > { %v3141_v13 = vadd.f32 %v1063_v12, %v1057_v10 }
 0x51d   : > { %v1070_v14 = vsel %vm473_vm1, %v3141_v13, 0.0  ;;  %v1126_v53 = vpop.permute.xlu0 %1125 }
 0x51e   : > { %v1071_v15 = vrot.slane %v1070_v14, 4 }
 0x520   : > { %v1072_v16 = vadd.f32 %v1071_v15, %v1070_v14 }
 0x522   : > { %v1073_v17 = vrot.slane %v1072_v16, 2 }
 0x524   : > { %v1074_v18 = vadd.f32 %v1073_v17, %v1072_v16 }
 0x526   : > { %v1075_v19 = vrot.slane %v1074_v18, 1 }
 0x528   : > { %v1076_v20 = vadd.f32 %v1075_v19, %v1074_v18 }
 0x52a   : > { %v1077_v22 = vmul.f32 0.125, %v1076_v20 }
 0x52c   : > { %v1078_v23 = vsub.f32 %v3141_v13, %v1077_v22 }
 0x52e   : > { %v1079_v24 = vmul.f32 %v1078_v23, %v1078_v23 }
 0x530   : > { %v1080_v25 = vsel %vm473_vm1, %v1079_v24, 0.0 }
 0x531   : > { %v1081_v26 = vrot.slane %v1080_v25, 4 }
 0x533   : > { %v1082_v27 = vadd.f32 %v1081_v26, %v1080_v25 }
 0x535   : > { %v1083_v28 = vrot.slane %v1082_v27, 2 }
 0x537   : > { %v1084_v29 = vadd.f32 %v1083_v28, %v1082_v27 }
 0x539   : > { %v1085_v30 = vrot.slane %v1084_v29, 1 }
 0x53b   : > { %v1086_v31 = vadd.f32 %v1085_v30, %v1084_v29 }
 0x53d   : > { %v1087_v32 = vmul.f32 0.125, %v1086_v31 }
 0x53f   : > { %v1088_v33 = vadd.f32 1e-05, %v1087_v32  ;;  %v2378_v32 = vld [vmem:[%s3313_s11 + $0x8] sm:$0xff] }
 0x541   : > { %2705 = vrsqrt.f32 %v1088_v33 }
 0x54b   : > { %v2706_v34 = vpop.eup %2705 }
 0x54c   : > { %v1090_v35 = vmul.f32 %v2706_v34, %v1078_v23 }
 0x54e   : > { %v1096_v37 = vmul.f32 %v1094_v36, %v1090_v35  ;;  %v1347_v36 = vpop.permute.xlu0 %1346 }
 0x550   : > { %v1102_v39 = vadd.f32 %v1100_v38, %v1096_v37 }
 0x552   : > { %2525 = vmatprep.subr.mxu0 %v1102_v39 }
 0x553   : > { %2526 = vmatpush3.msra.mxu0 %v1102_v39 }
 0x554   : > { %2528 = vmatmul.mubr.msk.f32.vlgmr.msra.gmra.mrb[4].mxu0 %vm584_vm2, %v2367_v40  ;;  %2544 = vmatprep.subr.mxu0 %v2821_v1 }
 0x555   : > { %2530 = vmatprep.mubr.msk.f32.mxu0 %vm584_vm2, %v2368_v41 }
 0x558   : > { %2531 = vmatmul.mubr.msk.f32.gmra.mrb[6].mxu0 %vm584_vm2, %v2369_v42 }
 0x559   : > { %2546 = vmatprep.mubr.msk.f32.mxu0 %vm2820_vm0, %v2821_v1 }
 0x627   : > { %v2529_v45 = vpop.f32.mrb[4].mxu0 }
 0x628   : > { %v1217_v46 = vadd.f32 %v2529_v45, %v1121_v43  ;;  %v1211_v47 = vpop.f32.mrb[5].mxu0 }
 0x629   : > { %v1212_v48 = vadd.f32 %v1211_v47, %v1116_v44 }
 0x62a   : > { %v1235_v49 = vmul.f32 0.044715, %v1217_v46  ;;  %v1231_v15 = vmul.f32 0.5, %v1217_v46 }
 0x62b   : > { %v1234_v51 = vmul.f32 0.044715, %v1212_v48  ;;  %v2532_v52 = vpop.f32.mrb[6].mxu0  ;;  %v1230_v17 = vmul.f32 0.5, %v1212_v48 }
 0x62c   : > { %v1239_v54 = vmul.f32 %v1235_v49, %v1217_v46  ;;  %v1227_v55 = vadd.f32 %v2532_v52, %v1131_v50  ;;  %v1221_v56 = vpop.f32.mrb[7].mxu0 }
 0x62d   : > { %v1238_v57 = vmul.f32 %v1234_v51, %v1212_v48  ;;  %v1222_v58 = vadd.f32 %v1221_v56, %v1126_v53 }
 0x62e   : > { %v1243_v21 = vmul.f32 %v1239_v54, %v1217_v46  ;;  %v1237_v59 = vmul.f32 0.044715, %v1227_v55  ;;  %v1233_v24 = vmul.f32 0.5, %v1227_v55 }
 0x62f   : > { %v1242_v60 = vmul.f32 %v1238_v57, %v1212_v48  ;;  %v1236_v61 = vmul.f32 0.044715, %v1222_v58  ;;  %v1232_v27 = vmul.f32 0.5, %v1222_v58 }
 0x630   : > { %v1247_v62 = vadd.f32 %v1243_v21, %v1217_v46  ;;  %v1241_v63 = vmul.f32 %v1237_v59, %v1227_v55  ;;  %v1384_v59 = vpop.permute.xlu0 %1383 }
 0x631   : > { %v1246_v2 = vadd.f32 %v1242_v60, %v1212_v48  ;;  %v1240_v3 = vmul.f32 %v1236_v61, %v1222_v58  ;;  %v2383_v61 = vld [vmem:[%s3307_s5 + $0x10] sm:$0xff] }
 0x632   : > { %v1251_v4 = vmul.f32 0.7978846, %v1247_v62  ;;  %v1245_v5 = vmul.f32 %v1241_v63, %v1227_v55  ;;  %v2388_v62 = vld [vmem:[%s3311_s9 + $0x40] sm:$0xff] }
 0x633   : > { %v1250_v6 = vmul.f32 0.7978846, %v1246_v2  ;;  %v1244_v7 = vmul.f32 %v1240_v3, %v1222_v58 }
 0x634   : > { %2707 = vtanh.f32 %v1251_v4  ;;  %v1249_v8 = vadd.f32 %v1245_v5, %v1227_v55 }
 0x635   : > { %2709 = vtanh.f32 %v1250_v6  ;;  %v1248_v9 = vadd.f32 %v1244_v7, %v1222_v58  ;;  %v1378_v58 = vpop.permute.xlu1 %1377 }
 0x636   : > { %v1253_v10 = vmul.f32 0.7978846, %v1249_v8 }
 0x637   : > { %v1252_v11 = vmul.f32 0.7978846, %v1248_v9 }
 0x638   : > { %2711 = vtanh.f32 %v1253_v10 }
 0x639   : > { %2713 = vtanh.f32 %v1252_v11  ;;  %v1468_v4 = vpop.permute.xlu1 %1467 }
 0x63e   : > { %v2708_v12 = vpop.eup %2707 }
 0x63f   : > { %v2710_v14 = vpop.eup %2709  ;;  %v1259_v16 = vadd.f32 1.0, %v2708_v12 }
 0x640   : > { %v1258_v18 = vadd.f32 1.0, %v2710_v14 }
 0x641   : > { %v1263_v19 = vmul.f32 %v1259_v16, %v1231_v15 }
 0x642   : > { %v2712_v20 = vpop.eup %2711  ;;  %v1262_v22 = vmul.f32 %v1258_v18, %v1230_v17 }
 0x643   : > { %v2714_v23 = vpop.eup %2713  ;;  %v1261_v25 = vadd.f32 1.0, %v2712_v20 }
 0x644   : > { %v2609_v26 = vpack.c.bf16 %v1263_v19, %v1262_v22  ;;  %v1260_v28 = vadd.f32 1.0, %v2714_v23 }
 0x645   : > { %v1265_v29 = vmul.f32 %v1261_v25, %v1233_v24 }
 0x646   : > { %2610 = vmatpush3.bf16.msra.mxu1 %v2609_v26  ;;  %v1264_v30 = vmul.f32 %v1260_v28, %v1232_v27 }
 0x647   : > { %2611 = vmatprep.subr.bf16.mxu1 %v2819_v0 }
 0x648   : > { %v2612_v31 = vpack.c.bf16 %v1265_v29, %v1264_v30  ;;  %v1499_v29 = vpop.permute.xlu0 %1498 }
 0x64a   : > { %2613 = vmatpush3.bf16.msra.mxu1 %v2612_v31  ;;  %v1505_v31 = vpop.permute.xlu1 %1504 }
 0x64d   : > { %2542 = vmatmul.mubr.msk.f32.vlgmr.msra.gmra.mrb[8].mxu1 %vm863_vm3, %v2378_v32 }
 0x64e   : > { %2551 = vmatprep.mubr.msk.f32.mxu1 %vm584_vm2, %v2388_v62 }
 0x720   : > { %v1337_v33 = vpop.f32.mrb[8].mxu1 }
 0x721   : > { %v1341_v34 = vadd.f32 %v1337_v33, %v3141_v13  ;;  %v2543_v35 = vpop.f32.mrb[9].mxu1  ;;  %v2389_v33 = vld [vmem:[%s3311_s9 + $0x48] sm:$0xff] }
 0x722   : > { %v2391_v35 = vld [vmem:[%s3311_s9 + $0x58] sm:$0xff] }
 0x723   : > { %v1349_v37 = vadd.f32 %v1347_v36, %v1341_v34  ;;  %v2390_v34 = vld [vmem:[%s3311_s9 + $0x50] sm:$0xff]  ;;  %v1526_v36 = vpop.permute.xlu1 %1525 }
 0x725   : > { %v1354_v38 = vsel %vm473_vm1, %v1349_v37, 0.0 }
 0x726   : > { %v1355_v39 = vrot.slane %v1354_v38, 4 }
 0x728   : > { %v1356_v40 = vadd.f32 %v1355_v39, %v1354_v38 }
 0x72a   : > { %v1357_v41 = vrot.slane %v1356_v40, 2 }
 0x72c   : > { %v1358_v42 = vadd.f32 %v1357_v41, %v1356_v40 }
 0x72e   : > { %v1359_v43 = vrot.slane %v1358_v42, 1 }
 0x730   : > { %v1360_v44 = vadd.f32 %v1359_v43, %v1358_v42  ;;  %v1536_v43 = vpop.permute.xlu1 %1535 }
 0x732   : > { %v1361_v45 = vmul.f32 0.125, %v1360_v44 }
 0x734   : > { %v1362_v46 = vsub.f32 %v1349_v37, %v1361_v45 }
 0x736   : > { %v1363_v47 = vmul.f32 %v1362_v46, %v1362_v46 }
 0x738   : > { %v1364_v48 = vsel %vm473_vm1, %v1363_v47, 0.0 }
 0x739   : > { %v1365_v49 = vrot.slane %v1364_v48, 4 }
 0x73b   : > { %v1366_v50 = vadd.f32 %v1365_v49, %v1364_v48 }
 0x73d   : > { %v1367_v51 = vrot.slane %v1366_v50, 2 }
 0x73f   : > { %v1368_v13 = vadd.f32 %v1367_v51, %v1366_v50 }
 0x741   : > { %v1369_v52 = vrot.slane %v1368_v13, 1 }
 0x743   : > { %v1370_v53 = vadd.f32 %v1369_v52, %v1368_v13 }
 0x745   : > { %v1371_v54 = vmul.f32 0.125, %v1370_v53 }
 0x747   : > { %v1372_v55 = vadd.f32 1e-05, %v1371_v54 }
 0x749   : > { %2715 = vrsqrt.f32 %v1372_v55 }
 0x753   : > { %v2716_v56 = vpop.eup %2715 }
 0x754   : > { %v1374_v57 = vmul.f32 %v2716_v56, %v1362_v46 }
 0x756   : > { %v1380_v21 = vmul.f32 %v1378_v58, %v1374_v57 }
 0x758   : > { %v1386_v60 = vadd.f32 %v1384_v59, %v1380_v21 }
 0x75a   : > { %2545 = vmatpush3.msra.mxu0 %v1386_v60 }
 0x75b   : > { %2547 = vmatmul.mubr.msk.f32.vlgmr.msra.gmra.mrb[8].mxu0 %vm584_vm2, %v2383_v61  ;;  %2614 = vmatprep.subr.bf16.mxu0 %v2819_v0 }
 0x75c   : > { %2565 = vmatprep.mubr.msk.f32.mxu0 %vm2820_vm0, %v2821_v1 }
 0x82e   : > { %v1458_v63 = vpop.f32.mrb[8].mxu0 }
 0x82f   : > { %v1462_v2 = vadd.f32 %v1458_v63, %v1349_v37  ;;  %v2548_v3 = vpop.f32.mrb[9].mxu0  ;;  %v1521_v37 = vpop.permute.xlu0 %1520 }
 0x831   : > { %v3181_v5 = vadd.f32 %v1468_v4, %v1462_v2 }
 0x833   : > { %v1475_v6 = vsel %vm473_vm1, %v3181_v5, 0.0  ;;  %v1531_v46 = vpop.permute.xlu0 %1530 }
 0x834   : > { %v1476_v7 = vrot.slane %v1475_v6, 4 }
 0x836   : > { %v1477_v8 = vadd.f32 %v1476_v7, %v1475_v6 }
 0x838   : > { %v1478_v9 = vrot.slane %v1477_v8, 2 }
 0x83a   : > { %v1479_v10 = vadd.f32 %v1478_v9, %v1477_v8 }
 0x83c   : > { %v1480_v11 = vrot.slane %v1479_v10, 1 }
 0x83e   : > { %v1481_v12 = vadd.f32 %v1480_v11, %v1479_v10 }
 0x840   : > { %v1482_v14 = vmul.f32 0.125, %v1481_v12 }
 0x842   : > { %v1483_v15 = vsub.f32 %v3181_v5, %v1482_v14 }
 0x844   : > { %v1484_v16 = vmul.f32 %v1483_v15, %v1483_v15 }
 0x846   : > { %v1485_v17 = vsel %vm473_vm1, %v1484_v16, 0.0 }
 0x847   : > { %v1486_v18 = vrot.slane %v1485_v17, 4 }
 0x849   : > { %v1487_v19 = vadd.f32 %v1486_v18, %v1485_v17 }
 0x84b   : > { %v1488_v20 = vrot.slane %v1487_v19, 2 }
 0x84d   : > { %v1489_v22 = vadd.f32 %v1488_v20, %v1487_v19 }
 0x84f   : > { %v1490_v23 = vrot.slane %v1489_v22, 1 }
 0x851   : > { %v1491_v24 = vadd.f32 %v1490_v23, %v1489_v22 }
 0x853   : > { %v1492_v25 = vmul.f32 0.125, %v1491_v24 }
 0x855   : > { %v1493_v26 = vadd.f32 1e-05, %v1492_v25  ;;  %v2400_v25 = vld [vmem:[%s3313_s11 + $0x10] sm:$0xff] }
 0x857   : > { %2717 = vrsqrt.f32 %v1493_v26 }
 0x861   : > { %v2718_v27 = vpop.eup %2717 }
 0x862   : > { %v1495_v28 = vmul.f32 %v2718_v27, %v1483_v15 }
 0x864   : > { %v1501_v30 = vmul.f32 %v1499_v29, %v1495_v28  ;;  %v1752_v29 = vpop.permute.xlu0 %1751 }
 0x866   : > { %v1507_v32 = vadd.f32 %v1505_v31, %v1501_v30 }
 0x868   : > { %2549 = vmatprep.subr.mxu1 %v1507_v32 }
 0x869   : > { %2550 = vmatpush3.msra.mxu1 %v1507_v32 }
 0x86a   : > { %2552 = vmatmul.mubr.msk.f32.vlgmr.msra.gmra.mrb[10].mxu1 %vm584_vm2, %v2389_v33  ;;  %2568 = vmatprep.subr.mxu1 %v2821_v1 }
 0x86b   : > { %2554 = vmatprep.mubr.msk.f32.mxu1 %vm584_vm2, %v2390_v34 }
 0x86e   : > { %2555 = vmatmul.mubr.msk.f32.gmra.mrb[12].mxu1 %vm584_vm2, %v2391_v35 }
 0x86f   : > { %2570 = vmatprep.mubr.msk.f32.mxu1 %vm2820_vm0, %v2821_v1 }
 0x93d   : > { %v2553_v38 = vpop.f32.mrb[10].mxu1 }
 0x93e   : > { %v1622_v39 = vadd.f32 %v2553_v38, %v1526_v36  ;;  %v1616_v40 = vpop.f32.mrb[11].mxu1 }
 0x93f   : > { %v1617_v41 = vadd.f32 %v1616_v40, %v1521_v37 }
 0x940   : > { %v1640_v42 = vmul.f32 0.044715, %v1622_v39  ;;  %v1636_v7 = vmul.f32 0.5, %v1622_v39 }
 0x941   : > { %v1639_v44 = vmul.f32 0.044715, %v1617_v41  ;;  %v2556_v45 = vpop.f32.mrb[12].mxu1  ;;  %v1635_v9 = vmul.f32 0.5, %v1617_v41 }
 0x942   : > { %v1644_v47 = vmul.f32 %v1640_v42, %v1622_v39  ;;  %v1632_v48 = vadd.f32 %v2556_v45, %v1536_v43  ;;  %v1626_v49 = vpop.f32.mrb[13].mxu1 }
 0x943   : > { %v1643_v50 = vmul.f32 %v1639_v44, %v1617_v41  ;;  %v1627_v51 = vadd.f32 %v1626_v49, %v1531_v46 }
 0x944   : > { %v1648_v13 = vmul.f32 %v1644_v47, %v1622_v39  ;;  %v1642_v52 = vmul.f32 0.044715, %v1632_v48  ;;  %v1638_v16 = vmul.f32 0.5, %v1632_v48 }
 0x945   : > { %v1647_v53 = vmul.f32 %v1643_v50, %v1617_v41  ;;  %v1641_v54 = vmul.f32 0.044715, %v1627_v51  ;;  %v1637_v19 = vmul.f32 0.5, %v1627_v51 }
 0x946   : > { %v1652_v55 = vadd.f32 %v1648_v13, %v1622_v39  ;;  %v1646_v56 = vmul.f32 %v1642_v52, %v1632_v48  ;;  %v1789_v52 = vpop.permute.xlu0 %1788 }
 0x947   : > { %v1651_v57 = vadd.f32 %v1647_v53, %v1617_v41  ;;  %v1645_v58 = vmul.f32 %v1641_v54, %v1627_v51  ;;  %v2405_v54 = vld [vmem:[%s3307_s5 + $0x18] sm:$0xff] }
 0x948   : > { %v1656_v21 = vmul.f32 0.7978846, %v1652_v55  ;;  %v1650_v59 = vmul.f32 %v1646_v56, %v1632_v48  ;;  %v2410_v55 = vld [vmem:[%s3311_s9 + $0x60] sm:$0xff] }
 0x949   : > { %v1655_v60 = vmul.f32 0.7978846, %v1651_v57  ;;  %v1649_v61 = vmul.f32 %v1645_v58, %v1627_v51 }
 0x94a   : > { %2719 = vtanh.f32 %v1656_v21  ;;  %v1654_v62 = vadd.f32 %v1650_v59, %v1632_v48 }
 0x94b   : > { %2721 = vtanh.f32 %v1655_v60  ;;  %v1653_v63 = vadd.f32 %v1649_v61, %v1627_v51  ;;  %v1783_v51 = vpop.permute.xlu1 %1782 }
 0x94c   : > { %v1658_v2 = vmul.f32 0.7978846, %v1654_v62 }
 0x94d   : > { %v1657_v3 = vmul.f32 0.7978846, %v1653_v63 }
 0x94e   : > { %2723 = vtanh.f32 %v1658_v2 }
 0x94f   : > { %2725 = vtanh.f32 %v1657_v3  ;;  %v1873_v21 = vpop.permute.xlu1 %1872 }
 0x954   : > { %v2720_v4 = vpop.eup %2719 }
 0x955   : > { %v2722_v6 = vpop.eup %2721  ;;  %v1664_v8 = vadd.f32 1.0, %v2720_v4 }
 0x956   : > { %v1663_v10 = vadd.f32 1.0, %v2722_v6 }
 0x957   : > { %v1668_v11 = vmul.f32 %v1664_v8, %v1636_v7 }
 0x958   : > { %v2724_v12 = vpop.eup %2723  ;;  %v1667_v14 = vmul.f32 %v1663_v10, %v1635_v9 }
 0x959   : > { %v2726_v15 = vpop.eup %2725  ;;  %v1666_v17 = vadd.f32 1.0, %v2724_v12 }
 0x95a   : > { %v2615_v18 = vpack.c.bf16 %v1668_v11, %v1667_v14  ;;  %v1665_v20 = vadd.f32 1.0, %v2726_v15 }
 0x95b   : > { %v1670_v22 = vmul.f32 %v1666_v17, %v1638_v16 }
 0x95c   : > { %2616 = vmatpush3.bf16.msra.mxu0 %v2615_v18  ;;  %v1669_v23 = vmul.f32 %v1665_v20, %v1637_v19 }
 0x95d   : > { %2617 = vmatprep.subr.bf16.mxu0 %v2819_v0 }
 0x95e   : > { %v2618_v24 = vpack.c.bf16 %v1670_v22, %v1669_v23  ;;  %v1904_v22 = vpop.permute.xlu0 %1903 }
 0x960   : > { %2619 = vmatpush3.bf16.msra.mxu0 %v2618_v24  ;;  %v1910_v24 = vpop.permute.xlu1 %1909 }
 0x963   : > { %2566 = vmatmul.mubr.msk.f32.vlgmr.msra.gmra.mrb[10].mxu0 %vm863_vm3, %v2400_v25 }
 0x964   : > { %2575 = vmatprep.mubr.msk.f32.mxu0 %vm584_vm2, %v2410_v55 }
 0xa36   : > { %v1742_v26 = vpop.f32.mrb[10].mxu0 }
 0xa37   : > { %v1746_v27 = vadd.f32 %v1742_v26, %v3181_v5  ;;  %v2567_v28 = vpop.f32.mrb[11].mxu0  ;;  %v2411_v26 = vld [vmem:[%s3311_s9 + $0x68] sm:$0xff] }
 0xa38   : > { %v2413_v28 = vld [vmem:[%s3311_s9 + $0x78] sm:$0xff] }
 0xa39   : > { %v1754_v30 = vadd.f32 %v1752_v29, %v1746_v27  ;;  %v2412_v27 = vld [vmem:[%s3311_s9 + $0x70] sm:$0xff]  ;;  %v1931_v29 = vpop.permute.xlu1 %1930 }
 0xa3b   : > { %v1759_v31 = vsel %vm473_vm1, %v1754_v30, 0.0 }
 0xa3c   : > { %v1760_v32 = vrot.slane %v1759_v31, 4 }
 0xa3e   : > { %v1761_v33 = vadd.f32 %v1760_v32, %v1759_v31 }
 0xa40   : > { %v1762_v34 = vrot.slane %v1761_v33, 2 }
 0xa42   : > { %v1763_v35 = vadd.f32 %v1762_v34, %v1761_v33 }
 0xa44   : > { %v1764_v36 = vrot.slane %v1763_v35, 1 }
 0xa46   : > { %v1765_v37 = vadd.f32 %v1764_v36, %v1763_v35  ;;  %v1941_v36 = vpop.permute.xlu1 %1940 }
 0xa48   : > { %v1766_v38 = vmul.f32 0.125, %v1765_v37 }
 0xa4a   : > { %v1767_v39 = vsub.f32 %v1754_v30, %v1766_v38 }
 0xa4c   : > { %v1768_v40 = vmul.f32 %v1767_v39, %v1767_v39 }
 0xa4e   : > { %v1769_v41 = vsel %vm473_vm1, %v1768_v40, 0.0 }
 0xa4f   : > { %v1770_v42 = vrot.slane %v1769_v41, 4 }
 0xa51   : > { %v1771_v43 = vadd.f32 %v1770_v42, %v1769_v41 }
 0xa53   : > { %v1772_v44 = vrot.slane %v1771_v43, 2 }
 0xa55   : > { %v1773_v5 = vadd.f32 %v1772_v44, %v1771_v43 }
 0xa57   : > { %v1774_v45 = vrot.slane %v1773_v5, 1 }
 0xa59   : > { %v1775_v46 = vadd.f32 %v1774_v45, %v1773_v5 }
 0xa5b   : > { %v1776_v47 = vmul.f32 0.125, %v1775_v46 }
 0xa5d   : > { %v1777_v48 = vadd.f32 1e-05, %v1776_v47 }
 0xa5f   : > { %2727 = vrsqrt.f32 %v1777_v48 }
 0xa69   : > { %v2728_v49 = vpop.eup %2727 }
 0xa6a   : > { %v1779_v50 = vmul.f32 %v2728_v49, %v1767_v39 }
 0xa6c   : > { %v1785_v13 = vmul.f32 %v1783_v51, %v1779_v50 }
 0xa6e   : > { %v1791_v53 = vadd.f32 %v1789_v52, %v1785_v13 }
 0xa70   : > { %2569 = vmatpush3.msra.mxu1 %v1791_v53 }
 0xa71   : > { %2571 = vmatmul.mubr.msk.f32.vlgmr.msra.gmra.mrb[14].mxu1 %vm584_vm2, %v2405_v54  ;;  %2620 = vmatprep.subr.bf16.mxu1 %v2819_v0 }
 0xa72   : > { %2589 = vmatprep.mubr.msk.f32.mxu1 %vm2820_vm0, %v2821_v1 }
 0xb44   : > { %v1863_v56 = vpop.f32.mrb[14].mxu1 }
 0xb45   : > { %v1867_v57 = vadd.f32 %v1863_v56, %v1754_v30  ;;  %v2572_v58 = vpop.f32.mrb[15].mxu1  ;;  %v1926_v30 = vpop.permute.xlu0 %1925 }
 0xb47   : > { %v3221_v59 = vadd.f32 %v1873_v21, %v1867_v57 }
 0xb49   : > { %v1880_v60 = vsel %vm473_vm1, %v3221_v59, 0.0  ;;  %v1936_v39 = vpop.permute.xlu0 %1935 }
 0xb4a   : > { %v1881_v61 = vrot.slane %v1880_v60, 4 }
 0xb4c   : > { %v1882_v62 = vadd.f32 %v1881_v61, %v1880_v60 }
 0xb4e   : > { %v1883_v63 = vrot.slane %v1882_v62, 2 }
 0xb50   : > { %v1884_v2 = vadd.f32 %v1883_v63, %v1882_v62 }
 0xb52   : > { %v1885_v3 = vrot.slane %v1884_v2, 1 }
 0xb54   : > { %v1886_v4 = vadd.f32 %v1885_v3, %v1884_v2 }
 0xb56   : > { %v1887_v6 = vmul.f32 0.125, %v1886_v4 }
 0xb58   : > { %v1888_v7 = vsub.f32 %v3221_v59, %v1887_v6 }
 0xb5a   : > { %v1889_v8 = vmul.f32 %v1888_v7, %v1888_v7 }
 0xb5c   : > { %v1890_v9 = vsel %vm473_vm1, %v1889_v8, 0.0 }
 0xb5d   : > { %v1891_v10 = vrot.slane %v1890_v9, 4 }
 0xb5f   : > { %v1892_v11 = vadd.f32 %v1891_v10, %v1890_v9 }
 0xb61   : > { %v1893_v12 = vrot.slane %v1892_v11, 2 }
 0xb63   : > { %v1894_v14 = vadd.f32 %v1893_v12, %v1892_v11 }
 0xb65   : > { %v1895_v15 = vrot.slane %v1894_v14, 1 }
 0xb67   : > { %v1896_v16 = vadd.f32 %v1895_v15, %v1894_v14 }
 0xb69   : > { %v1897_v17 = vmul.f32 0.125, %v1896_v16  ;;  %v2422_v16 = vld [vmem:[%s3313_s11 + $0x18] sm:$0xff] }
 0xb6b   : > { %v1898_v18 = vadd.f32 1e-05, %v1897_v17  ;;  %v2160_v17 = vlaneseq }
 0xb6d   : > { %2729 = vrsqrt.f32 %v1898_v18  ;;  %v2163_v18 = vshrl.u32 %v2160_v17, 7 }
 0xb77   : > { %v2730_v19 = vpop.eup %2729 }
 0xb78   : > { %v1900_v20 = vmul.f32 %v2730_v19, %v1888_v7  ;;  %v2164_v19 = vadd.s32 8, %v2163_v18 }
 0xb7a   : > { %v1906_v23 = vmul.f32 %v1904_v22, %v1900_v20  ;;  %v2169_v20 = vadd.s32 1, %v2163_v18  ;;  %v2170_v22 = vadd.s32 1, %v2164_v19 }
 0xb7c   : > { %v1912_v25 = vadd.f32 %v1910_v24, %v1906_v23  ;;  %v2161_v23 = vand.u32 127, %v2160_v17  ;;  %v2165_v24 = vmul.u32 2, %v2163_v18 }
 0xb7e   : > { %2573 = vmatprep.subr.mxu0 %v1912_v25  ;;  %vm2167_vm4 = vcmp.ge.s32.totalorder %v2161_v23, %v2165_v24 }
 0xb7f   : > { %2574 = vmatpush3.msra.mxu0 %v1912_v25  ;;  %v2166_v25 = vmul.u32 2, %v2164_v19 }
 0xb80   : > { %2576 = vmatmul.mubr.msk.f32.vlgmr.msra.gmra.mrb[12].mxu0 %vm584_vm2, %v2411_v26  ;;  %2626 = vmatprep.subr.bf16.mxu0 %v2819_v0  ;;  %v2171_v26 = vmul.u32 2, %v2169_v20 }
 0xb81   : > { %2578 = vmatprep.mubr.msk.f32.mxu0 %vm584_vm2, %v2412_v27  ;;  %v2172_v27 = vmul.u32 2, %v2170_v22  ;;  %vm2168_vm5 = vcmp.ge.s32.totalorder %v2161_v23, %v2166_v25 }
 0xb82   : > { %vm2173_vm6 = vcmp.lt.s32.totalorder %v2161_v23, %v2171_v26 }
 0xb83   : > { %vm2174_vm7 = vcmp.lt.s32.totalorder %v2161_v23, %v2172_v27  ;;  %vm2175_vm8 = vmand %vm2167_vm4, %vm2173_vm6 }
 0xb84   : > { %2579 = vmatmul.mubr.msk.f32.gmra.mrb[14].mxu0 %vm584_vm2, %v2413_v28  ;;  %vm2176_vm9 = vmand %vm2168_vm5, %vm2174_vm7 }
 0xb85   : > { %2596 = vmatprep.mubr.msk.f32.mxu0 %vm2820_vm0, %v2821_v1  ;;  %vm2627_vm10 = vmpackc.low %vm2176_vm9, %vm2175_vm8 }
 0xc53   : > { %v2577_v31 = vpop.f32.mrb[12].mxu0 }
 0xc54   : > { %v2027_v32 = vadd.f32 %v2577_v31, %v1931_v29  ;;  %v2021_v33 = vpop.f32.mrb[13].mxu0  ;;  %v2157_v31 = vpop.permute.xlu0 %2156 }
 0xc55   : > { %v2022_v34 = vadd.f32 %v2021_v33, %v1926_v30 }
 0xc56   : > { %v2045_v35 = vmul.f32 0.044715, %v2027_v32  ;;  %v2041_v60 = vmul.f32 0.5, %v2027_v32 }
 0xc57   : > { %v2044_v37 = vmul.f32 0.044715, %v2022_v34  ;;  %v2580_v38 = vpop.f32.mrb[14].mxu0  ;;  %v2040_v62 = vmul.f32 0.5, %v2022_v34 }
 0xc58   : > { %v2049_v40 = vmul.f32 %v2045_v35, %v2027_v32  ;;  %v2037_v41 = vadd.f32 %v2580_v38, %v1941_v36  ;;  %v2031_v42 = vpop.f32.mrb[15].mxu0 }
 0xc59   : > { %v2048_v43 = vmul.f32 %v2044_v37, %v2022_v34  ;;  %v2032_v44 = vadd.f32 %v2031_v42, %v1936_v39 }
 0xc5a   : > { %v2053_v5 = vmul.f32 %v2049_v40, %v2027_v32  ;;  %v2047_v45 = vmul.f32 0.044715, %v2037_v41  ;;  %v2043_v7 = vmul.f32 0.5, %v2037_v41 }
 0xc5b   : > { %v2052_v46 = vmul.f32 %v2048_v43, %v2022_v34  ;;  %v2046_v1 = vmul.f32 0.044715, %v2032_v44  ;;  %v2042_v10 = vmul.f32 0.5, %v2032_v44 }
 0xc5c   : > { %v2057_v47 = vadd.f32 %v2053_v5, %v2027_v32  ;;  %v2051_v48 = vmul.f32 %v2047_v45, %v2037_v41 }
 0xc5d   : > { %v2056_v49 = vadd.f32 %v2052_v46, %v2022_v34  ;;  %v2050_v50 = vmul.f32 %v2046_v1, %v2032_v44 }
 0xc5e   : > { %v2061_v51 = vmul.f32 0.7978846, %v2057_v47  ;;  %v2055_v13 = vmul.f32 %v2051_v48, %v2037_v41 }
 0xc5f   : > { %v2060_v52 = vmul.f32 0.7978846, %v2056_v49  ;;  %v2054_v53 = vmul.f32 %v2050_v50, %v2032_v44 }
 0xc60   : > { %2731 = vtanh.f32 %v2061_v51  ;;  %v2059_v54 = vadd.f32 %v2055_v13, %v2037_v41 }
 0xc61   : > { %2733 = vtanh.f32 %v2060_v52  ;;  %v2058_v55 = vadd.f32 %v2054_v53, %v2032_v44 }
 0xc62   : > { %v2063_v56 = vmul.f32 0.7978846, %v2059_v54 }
 0xc63   : > { %v2062_v57 = vmul.f32 0.7978846, %v2058_v55 }
 0xc64   : > { %2735 = vtanh.f32 %v2063_v56 }
 0xc65   : > { %2737 = vtanh.f32 %v2062_v57 }
 0xc6a   : > { %v2732_v58 = vpop.eup %2731 }
 0xc6b   : > { %v2734_v21 = vpop.eup %2733  ;;  %v2069_v61 = vadd.f32 1.0, %v2732_v58 }
 0xc6c   : > { %v2068_v63 = vadd.f32 1.0, %v2734_v21 }
 0xc6d   : > { %v2073_v2 = vmul.f32 %v2069_v61, %v2041_v60 }
 0xc6e   : > { %v2736_v3 = vpop.eup %2735  ;;  %v2072_v4 = vmul.f32 %v2068_v63, %v2040_v62 }
 0xc6f   : > { %v2738_v6 = vpop.eup %2737  ;;  %v2071_v8 = vadd.f32 1.0, %v2736_v3 }
 0xc70   : > { %v2621_v9 = vpack.c.bf16 %v2073_v2, %v2072_v4  ;;  %v2070_v11 = vadd.f32 1.0, %v2738_v6 }
 0xc71   : > { %v2075_v12 = vmul.f32 %v2071_v8, %v2043_v7 }
 0xc72   : > { %2622 = vmatpush3.bf16.msra.mxu1 %v2621_v9  ;;  %v2074_v14 = vmul.f32 %v2070_v11, %v2042_v10 }
 0xc73   : > { %2623 = vmatprep.subr.bf16.mxu1 %v2819_v0  ;;  %v2823_v0 = vmov 1.0|1.0  }
 0xc74   : > { %v2624_v15 = vpack.c.bf16 %v2075_v12, %v2074_v14  ;;  %2628 = vmatpush3.bf16.msk.msra.mxu0 %vm2627_vm10, %v2823_v0 }
 0xc76   : > { %2625 = vmatpush3.bf16.msra.mxu1 %v2624_v15 }
 0xc79   : > { %2590 = vmatmul.mubr.msk.f32.vlgmr.msra.gmra.mrb[16].mxu1 %vm863_vm3, %v2422_v16 }
 0xd4c   : > { %v2147_v28 = vpop.f32.mrb[16].mxu1 }
 0xd4d   : > { %v2151_v29 = vadd.f32 %v2147_v28, %v3221_v59  ;;  %v2591_v30 = vpop.f32.mrb[17].mxu1 }
 0xd4f   : > { %v2159_v32 = vadd.f32 %v2157_v31, %v2151_v29 }
 0xd51   : > { %2597 = vmatmul.mubr.msk.f32.vlgmr.msra.gmra.mrb[16].mxu0 %vm473_vm1, %v2159_v32 }
 0xe24   : > { %v2250_v59 = vpop.f32.mrb[16].mxu0 }
 0xe25   : > { %2254 = vst.msk [vmem:[%s455_s22] sm:$0xff] %vm863_vm3, %v2250_v59  ;;  %v2598_v33 = vpop.f32.mrb[17].mxu0 }
 0xe26   : > { %2752 = shalt.err (!%p2749_p5)
}
 0xe27   : > { %s2753_s2 = scalar_lea.hbm %s3254_s17, 128  ;;  %s2757_s15 = scalar_lea.hbm %s3315_s13, 256 }
 0xe28   : > { %p2754_p6 = scmp.ne.s32.totalorder %s3254_s17, %s2753_s2  ;;  %p2758_p10 = scmp.lt.u32.totalorder %s3254_s17, %s3315_s13 }
 0xe29   : > { %p2759_p11 = scmp.lt.u32.totalorder %s2757_s15, %s2753_s2  ;;  %p2761_p13 = scmp.lt.u32.totalorder %s2753_s2, %s3254_s17 }
 0xe2a   : > { %p2755_p7 = pnand %p2754_p6, %p2935_p4 }
 0xe2b   : > { %p2760_p12 = por %p2759_p11, %p2758_p10 }
 0xe2c   : > { %p2756_p9 = pneg %p2755_p7 }
 0xe2d   : > { %p2762_p0 = por %p2761_p13, %p2760_p12 }
 0xe2f   : > { %p2763_p1 = pnand %p2762_p0, %p2756_p9 }
 0xe31   : > { %2766 = shalt.err (!%p2763_p1)
}
 0xe32   : > { %2629 = dma.vmem_to_hbm [thread:$0]  (%p2935_p4), %s3256_s23, 128, %s3254_s17, %s2256_s16  }
 0xe33 PF: > { %p2635_p2 = scmp.ge.s32.totalorder %s2817_s30, 2  ;;  %s2282_s14 = sand.u32 1, %s2797_s25  }
 0xe34   : > { %s2283_s29 = scalar_lea.sflag [#allocation3], %s2282_s14 }
 0xe35   : > { %p2632_p3 = pnand %p2635_p2, %p2942_p8 }
 0xe37   : > { %2792 = dma.done.wait (!%p2632_p3), %s2283_s29, 128  }
 0xe38   : > { %2794 = vsyncadd (!%p2632_p3), %s2283_s29, 4294967168  ;;  %s26_s30 = sadd.s32 1, %s2817_s30   ;;  %s3324_s28 = sld [smem:[#allocation5_spill]] }
 0xe39   : > { %p23_p5 = scmp.ge.s32.totalorder %s26_s30, 4   ;;  %s3325_s29 = sld [smem:[#allocation6_spill]] }
 0xe3a   : > { %s3326_s25 = smov %s2801_s26  ;;  %s3327_s26 = smov %s2805_s27 }
 0xe3b   : > { %s3328_s27 = smov %s2948_s21  ;;  %25 = sbr.rel (!%p23_p5) target bundleno = 6 (0x6), region = 137 }
 0xe42   :  { %2288 = vsyncpa [#allocation3], 1 }
 0xe43   :  { %2290 = vsyncpa [#allocation3 + $0x1], 1 }

</bundles_post_ra>
